<compile_context>
chip_gen: v7x
topology: tpu7x:2x2x1
jax: 0.10.0
libtpu: 0.0.40
codegen_flags: <defaults>
</compile_context>

<pallas_src>
import numpy as np
import jax
import jax.numpy as jnp
from jax.experimental import pallas as pl
from jax.experimental.pallas import tpu as pltpu


def critic_kernel(x_ref, w1_ref, b1_ref, w2_ref, b2_ref, w3_ref, b3_ref, o_ref):
    # x: [TB, D] bf16   w1: [D, 512] bf16   b1: [1, 512] f32
    # w2: [512, 256] bf16   b2: [1, 256] f32   w3: [1, 256] bf16   b3: [1, 1] f32
    x = x_ref[...]

    # Linear 1 (bf16 MXU, f32 accumulation) + LeakyReLU(0.2)
    h1 = jnp.dot(x, w1_ref[...], preferred_element_type=jnp.float32) + b1_ref[...]
    h1 = jnp.where(h1 > 0, h1, 0.2 * h1)

    # Linear 2 + LeakyReLU(0.2)
    h2 = jnp.dot(h1.astype(w2_ref.dtype), w2_ref[...],
                 preferred_element_type=jnp.float32) + b2_ref[...]
    h2 = jnp.where(h2 > 0, h2, 0.2 * h2)

    # Linear 3 (out_features == 1): per-row dot on the VPU instead of a
    # 1-column MXU matmul (avoids masked stores / MXU push-pop latency).
    w3 = w3_ref[...].astype(jnp.float32)                     # [1, 256]
    out = jnp.sum(h2 * w3, axis=-1, keepdims=True) + b3_ref[...]
    o_ref[...] = out.astype(o_ref.dtype)


def critic_forward(img, params):
    """img: [B, C, H, W] float32.  Returns validity [B, 1] float32."""
    w1, b1, w2, b2, w3, b3 = params
    B = img.shape[0]
    x = img.reshape(B, -1).astype(jnp.bfloat16)              # same as img.view(B, -1)
    D = x.shape[1]

    # bf16 weights (half the HBM bytes / VMEM footprint; f32 accumulation on MXU).
    w1b = w1.astype(jnp.bfloat16)
    w2b = w2.astype(jnp.bfloat16)
    w3b = w3.reshape(1, -1).astype(jnp.bfloat16)             # row layout for the VPU dot
    b1f = b1.astype(jnp.float32)
    b2f = b2.astype(jnp.float32)
    b3f = b3.reshape(1, 1).astype(jnp.float32)

    # Batch tile: 128 MXU rows when the batch is large enough, otherwise the
    # smallest sublane-aligned tile that covers the (padded) batch.
    if B >= 128:
        TB = 128
    else:
        TB = max(8, ((B + 7) // 8) * 8)
    B_pad = pl.cdiv(B, TB) * TB
    if B_pad != B:
        x = jnp.pad(x, ((0, B_pad - B), (0, 0)))
    grid = (B_pad // TB,)

    def _bytes(a):
        return int(a.size) * a.dtype.itemsize

    resident = sum(_bytes(a) for a in (w1b, b1f, w2b, b2f, w3b, b3f))
    tile_bytes = TB * D * 2 + TB * 4                          # one x tile + one out tile
    # Everything is double-buffered by the pipeline; add headroom, clamp under
    # v7x's 64 MiB physical VMEM.
    vmem_limit = int(min(max(2 * (resident + tile_bytes) + (4 << 20), 16 << 20), 60 << 20))

    flops = 2 * B_pad * (D * 512 + 512 * 256 + 256)
    bytes_accessed = _bytes(x) + resident + B_pad * 4

    out = pl.pallas_call(
        critic_kernel,
        out_shape=jax.ShapeDtypeStruct((B_pad, 1), jnp.float32),
        grid=grid,
        in_specs=[
            pl.BlockSpec((TB, D), lambda i: (i, 0)),          # x: streamed per batch tile
            pl.BlockSpec((D, 512), lambda i: (0, 0)),         # weights: VMEM-resident
            pl.BlockSpec((1, 512), lambda i: (0, 0)),
            pl.BlockSpec((512, 256), lambda i: (0, 0)),
            pl.BlockSpec((1, 256), lambda i: (0, 0)),
            pl.BlockSpec((1, 256), lambda i: (0, 0)),
            pl.BlockSpec((1, 1), lambda i: (0, 0)),
        ],
        out_specs=pl.BlockSpec((TB, 1), lambda i: (i, 0)),
        compiler_params=pltpu.CompilerParams(
            dimension_semantics=("parallel",),                # v7x: shard batch over 2 TCs
            vmem_limit_bytes=vmem_limit,
        ),
        cost_estimate=pl.CostEstimate(
            flops=flops, bytes_accessed=bytes_accessed, transcendentals=0),
    )(x, w1b, b1f, w2b, b2f, w3b, b3f)
    return out[:B]


def init_params(key, in_features):
    """Deterministic init mirroring nn.Linear default (uniform +/- 1/sqrt(fan_in)).
    The module's _initialize_weights only touches Conv2d layers (none here), so
    the Linear layers keep PyTorch's default init scheme."""
    dims = [(in_features, 512), (512, 256), (256, 1)]
    params = []
    for (fan_in, fan_out) in dims:
        key, kw, kb = jax.random.split(key, 3)
        bound = 1.0 / np.sqrt(fan_in)
        w = jax.random.uniform(kw, (fan_in, fan_out), jnp.float32, -bound, bound)
        b = jax.random.uniform(kb, (1, fan_out), jnp.float32, -bound, bound)
        params += [w, b]
    return tuple(params)


if __name__ == "__main__":
    key = jax.random.PRNGKey(0)
    k_img, k_par = jax.random.split(key)

    # Small image shape consistent with the module: img_shape = (C, H, W)
    B, C, H, W = 2, 4, 16, 16
    D = C * H * W  # 1024 input features

    img = jax.random.normal(k_img, (B, C, H, W), dtype=jnp.float32)
    params = init_params(k_par, D)

    validity = jax.block_until_ready(critic_forward(img, params))
    assert validity.shape == (B, 1)

    # Reference in plain JAX using the same bf16-quantized operands (the kernel
    # quantizes x / weights to bf16; accumulation stays f32).
    w1, b1, w2, b2, w3, b3 = params
    q = lambda a: a.astype(jnp.bfloat16).astype(jnp.float32)
    hp = jax.lax.Precision.HIGHEST
    r = jnp.dot(q(img.reshape(B, -1)), q(w1), precision=hp) + b1
    r = jnp.where(r > 0, r, 0.2 * r)
    r = jnp.dot(q(r), q(w2), precision=hp) + b2
    r = jnp.where(r > 0, r, 0.2 * r)
    r = jnp.dot(r, q(w3), precision=hp) + b3

    np.testing.assert_allclose(np.asarray(validity), np.asarray(r), rtol=5e-3, atol=5e-3)

    print("KERNEL_OK")
</pallas_src>

<mosaic_0001>
module attributes {stable_mosaic.version = 11 : i64} {
  func.func @critic_kernel(%arg0: i32, %arg1: memref<8x1024xbf16, #tpu.memory_space<vmem>>, %arg2: memref<1024x512xbf16, #tpu.memory_space<vmem>>, %arg3: memref<1x512xf32, #tpu.memory_space<vmem>>, %arg4: memref<512x256xbf16, #tpu.memory_space<vmem>>, %arg5: memref<1x256xf32, #tpu.memory_space<vmem>>, %arg6: memref<1x256xbf16, #tpu.memory_space<vmem>>, %arg7: memref<1x1xf32, #tpu.memory_space<vmem>>, %arg8: memref<8x1xf32, #tpu.memory_space<vmem>>) attributes {dimension_semantics = [#tpu.dimension_semantics<parallel>], iteration_bounds = array<i64: 1>, scalar_prefetch = 0 : i64, scratch_operands = 0 : i64, tpu.core_type = #tpu.core_type<tc>, window_params = [{transform_indices = @transform_0, window_bounds = array<i64: 8, 1024>}, {pipeline_mode = #tpu.pipeline_mode<synchronous>, transform_indices = @transform_1, window_bounds = array<i64: 1024, 512>}, {pipeline_mode = #tpu.pipeline_mode<synchronous>, transform_indices = @transform_2, window_bounds = array<i64: 1, 512>}, {pipeline_mode = #tpu.pipeline_mode<synchronous>, transform_indices = @transform_3, window_bounds = array<i64: 512, 256>}, {pipeline_mode = #tpu.pipeline_mode<synchronous>, transform_indices = @transform_4, window_bounds = array<i64: 1, 256>}, {pipeline_mode = #tpu.pipeline_mode<synchronous>, transform_indices = @transform_5, window_bounds = array<i64: 1, 256>}, {pipeline_mode = #tpu.pipeline_mode<synchronous>, transform_indices = @transform_6, window_bounds = array<i64: 1, 1>}, {transform_indices = @transform_7, window_bounds = array<i64: 8, 1>}]} {
    %c0 = arith.constant 0 : index
    %c0_0 = arith.constant 0 : index
    %0 = vector.load %arg1[%c0, %c0_0] : memref<8x1024xbf16, #tpu.memory_space<vmem>>, vector<8x1024xbf16>
    %c0_1 = arith.constant 0 : index
    %c0_2 = arith.constant 0 : index
    %1 = vector.load %arg2[%c0_1, %c0_2] : memref<1024x512xbf16, #tpu.memory_space<vmem>>, vector<1024x512xbf16>
    %cst = arith.constant dense<0.000000e+00> : vector<8x512xf32>
    %2 = tpu.matmul %0, %1, %cst {dimension_numbers = #tpu.dot_dimension_numbers<[1], [0], [0], [1], [0, 0, 1, 1], [], []>} : vector<8x1024xbf16>, vector<1024x512xbf16>, vector<8x512xf32> -> vector<8x512xf32>
    %c0_3 = arith.constant 0 : index
    %c0_4 = arith.constant 0 : index
    %3 = vector.load %arg3[%c0_3, %c0_4] : memref<1x512xf32, #tpu.memory_space<vmem>>, vector<1x512xf32>
    %4 = vector.broadcast %3 : vector<1x512xf32> to vector<8x512xf32>
    %5 = arith.addf %2, %4 : vector<8x512xf32>
    %cst_5 = arith.constant 0.000000e+00 : f32
    %6 = vector.broadcast %cst_5 : f32 to vector<8x512xf32>
    %7 = arith.cmpf ogt, %5, %6 : vector<8x512xf32>
    %cst_6 = arith.constant 2.000000e-01 : f32
    %8 = vector.broadcast %cst_6 : f32 to vector<8x512xf32>
    %9 = arith.mulf %8, %5 : vector<8x512xf32>
    %10 = arith.select %7, %5, %9 : vector<8x512xi1>, vector<8x512xf32>
    %11 = arith.truncf %10 : vector<8x512xf32> to vector<8x512xbf16>
    %c0_7 = arith.constant 0 : index
    %c0_8 = arith.constant 0 : index
    %12 = vector.load %arg4[%c0_7, %c0_8] : memref<512x256xbf16, #tpu.memory_space<vmem>>, vector<512x256xbf16>
    %cst_9 = arith.constant dense<0.000000e+00> : vector<8x256xf32>
    %13 = tpu.matmul %11, %12, %cst_9 {dimension_numbers = #tpu.dot_dimension_numbers<[1], [0], [0], [1], [0, 0, 1, 1], [], []>} : vector<8x512xbf16>, vector<512x256xbf16>, vector<8x256xf32> -> vector<8x256xf32>
    %c0_10 = arith.constant 0 : index
    %c0_11 = arith.constant 0 : index
    %14 = vector.load %arg5[%c0_10, %c0_11] : memref<1x256xf32, #tpu.memory_space<vmem>>, vector<1x256xf32>
    %15 = vector.broadcast %14 : vector<1x256xf32> to vector<8x256xf32>
    %16 = arith.addf %13, %15 : vector<8x256xf32>
    %cst_12 = arith.constant 0.000000e+00 : f32
    %17 = vector.broadcast %cst_12 : f32 to vector<8x256xf32>
    %18 = arith.cmpf ogt, %16, %17 : vector<8x256xf32>
    %cst_13 = arith.constant 2.000000e-01 : f32
    %19 = vector.broadcast %cst_13 : f32 to vector<8x256xf32>
    %20 = arith.mulf %19, %16 : vector<8x256xf32>
    %21 = arith.select %18, %16, %20 : vector<8x256xi1>, vector<8x256xf32>
    %c0_14 = arith.constant 0 : index
    %c0_15 = arith.constant 0 : index
    %22 = vector.load %arg6[%c0_14, %c0_15] : memref<1x256xbf16, #tpu.memory_space<vmem>>, vector<1x256xbf16>
    %23 = arith.extf %22 : vector<1x256xbf16> to vector<1x256xf32>
    %24 = vector.broadcast %23 : vector<1x256xf32> to vector<8x256xf32>
    %25 = arith.mulf %21, %24 : vector<8x256xf32>
    %cst_16 = arith.constant dense<0.000000e+00> : vector<8xf32>
    %26 = vector.multi_reduction <add>, %25, %cst_16 [1] : vector<8x256xf32> to vector<8xf32>
    %27 = vector.shape_cast %26 : vector<8xf32> to vector<8x1xf32>
    %c0_17 = arith.constant 0 : index
    %c0_18 = arith.constant 0 : index
    %28 = vector.load %arg7[%c0_17, %c0_18] : memref<1x1xf32, #tpu.memory_space<vmem>>, vector<1x1xf32>
    %29 = vector.broadcast %28 : vector<1x1xf32> to vector<8x1xf32>
    %30 = arith.addf %27, %29 : vector<8x1xf32>
    %c0_19 = arith.constant 0 : index
    %c0_20 = arith.constant 0 : index
    %31 = vector.load %arg8[%c0_19, %c0_20] : memref<8x1xf32, #tpu.memory_space<vmem>>, vector<8x1xf32>
    tpu.vector_store %arg8[%c0_19, %c0_20], %30 {strides = array<i32>} : memref<8x1xf32, #tpu.memory_space<vmem>>, vector<8x1xf32>,
    return
  }
  func.func @transform_0(%arg0: i32) -> (i32, i32) {
    %c0_i32 = arith.constant 0 : i32
    %c0_i32_0 = arith.constant 0 : i32
    return %arg0, %c0_i32 : i32, i32
  }
  func.func @transform_1(%arg0: i32) -> (i32, i32) {
    %c0_i32 = arith.constant 0 : i32
    %c0_i32_0 = arith.constant 0 : i32
    %c0_i32_1 = arith.constant 0 : i32
    return %c0_i32, %c0_i32_0 : i32, i32
  }
  func.func @transform_2(%arg0: i32) -> (i32, i32) {
    %c0_i32 = arith.constant 0 : i32
    %c0_i32_0 = arith.constant 0 : i32
    %c0_i32_1 = arith.constant 0 : i32
    return %c0_i32, %c0_i32_0 : i32, i32
  }
  func.func @transform_3(%arg0: i32) -> (i32, i32) {
    %c0_i32 = arith.constant 0 : i32
    %c0_i32_0 = arith.constant 0 : i32
    %c0_i32_1 = arith.constant 0 : i32
    return %c0_i32, %c0_i32_0 : i32, i32
  }
  func.func @transform_4(%arg0: i32) -> (i32, i32) {
    %c0_i32 = arith.constant 0 : i32
    %c0_i32_0 = arith.constant 0 : i32
    %c0_i32_1 = arith.constant 0 : i32
    return %c0_i32, %c0_i32_0 : i32, i32
  }
  func.func @transform_5(%arg0: i32) -> (i32, i32) {
    %c0_i32 = arith.constant 0 : i32
    %c0_i32_0 = arith.constant 0 : i32
    %c0_i32_1 = arith.constant 0 : i32
    return %c0_i32, %c0_i32_0 : i32, i32
  }
  func.func @transform_6(%arg0: i32) -> (i32, i32) {
    %c0_i32 = arith.constant 0 : i32
    %c0_i32_0 = arith.constant 0 : i32
    %c0_i32_1 = arith.constant 0 : i32
    return %c0_i32, %c0_i32_0 : i32, i32
  }
  func.func @transform_7(%arg0: i32) -> (i32, i32) {
    %c0_i32 = arith.constant 0 : i32
    %c0_i32_0 = arith.constant 0 : i32
    return %arg0, %c0_i32 : i32, i32
  }
}

</mosaic_0001>

<bundles_post_ra>
// kernel: tpu_custom_call.1
= control target key start
LH: loop header
LB: loop body
LE: loop exit
PB: predicated region body
PF: predicated region fallthrough
CT: control target
= control target key end

     0   :  { %s3618_s0 = inlined_call_operand.hbm [shape: bf16[8,1024], index: 0, kind: input, shape index: {}]   ;;  %s3619_s1 = inlined_call_operand.hbm [shape: bf16[1024,512], index: 1, kind: input, shape index: {}]   ;;  %s3620_s2 = inlined_call_operand.vmem [shape: f32[1,512], index: 2, kind: input, shape index: {}]   ;;  %s3621_s3 = inlined_call_operand.hbm [shape: bf16[512,256], index: 3, kind: input, shape index: {}]   ;;  %s3622_s4 = inlined_call_operand.vmem [shape: f32[1,256], index: 4, kind: input, shape index: {}]   ;;  %s3623_s5 = inlined_call_operand.vmem [shape: bf16[1,256], index: 5, kind: input, shape index: {}]   ;;  %s3624_s6 = inlined_call_operand.<no memory space> [shape: f32[1,1], index: 6, kind: input, shape index: {}]   ;;  %s3625_s7 = inlined_call_operand.vmem [shape: f32[8,1], index: 7, kind: output, shape index: {}]  }
   0x1   :  { %v12_v0 = vstv %s3624_s6 }
   0x2   :  { %13 = vst [vmem:[#allocation2] sm:$0x1] %v12_v0 }
   0x3   :  { %14 = vsyncpa [#allocation4], 0 }
   0x4   :  { %15 = vsyncpa [#allocation6], 0  ;;  %s3453_s26 = smov [#allocation5]   ;;  %s3383_s30 = scalar_lea.hbm %s3619_s1, 32768 }
   0x5   :  { %s31_s27 = sshll.u32 %s3453_s26, 4  ;;  %p3384_p0 = scmp.ne.s32.totalorder %s3619_s1, %s3383_s30  ;;  %s32_s27 = int_to_ptr.vmem [resolvable:$true] %s31_s27 }
   0x6   :  { %p3387_p1 = scmp.lt.u32.totalorder %s3383_s30, %s3619_s1 }
   0x8   :  { %p3389_p2 = pnand %p3387_p1, %p3384_p0 }
   0xa   :  { %3392 = shalt.err (!%p3389_p2)
}
   0xb   :  { %s3393_s6 = scalar_lea.vmem %s32_s27, 32768  ;;  %p3398_p4 = scmp.lt.s32.totalorder %s32_s27, %s32_s27 }
   0xc   :  { %p3394_p3 = scmp.ne.s32.totalorder %s32_s27, %s3393_s6  ;;  %p3399_p5 = scmp.lt.s32.totalorder %s3393_s6, %s3393_s6 }
   0xe   :  { %p3400_p6 = por %p3399_p5, %p3398_p4 }
  0x10   :  { %p3401_p7 = pnand %p3400_p6, %p3394_p3 }
  0x12   :  { %3404 = shalt.err (!%p3401_p7)
}
  0x13   :  { %s3454_s12 = smov 256   ;;  %s3455_s13 = smov 16  }
  0x14   :  { %37 = dma.hbm_to_vmem [thread:$0]  %s3619_s1, 32768, %s32_s27, [#allocation6], %s3454_s12, %s3454_s12, %s3455_s13  }
  0x15   :  { %s3456_s16 = smov [#allocation3]   ;;  %s3457_s18 = smov [#allocation7]  }
  0x16   :  { %s22_s17 = sshll.u32 %s3456_s16, 4  ;;  %s45_s19 = sshll.u32 %s3457_s18, 4  ;;  %s23_s17 = int_to_ptr.vmem [resolvable:$true] %s22_s17  ;;  %s46_s19 = int_to_ptr.vmem [resolvable:$true] %s45_s19 }
  0x17   :  { %s3405_s22 = scalar_lea.hbm %s3618_s0, 512 }
  0x18   :  { %p3406_p8 = scmp.ne.s32.totalorder %s3618_s0, %s3405_s22  ;;  %p3409_p9 = scmp.lt.u32.totalorder %s3405_s22, %s3618_s0 }
  0x1a   :  { %p3411_p10 = pnand %p3409_p9, %p3406_p8 }
  0x1c   :  { %3414 = shalt.err (!%p3411_p10)
}
  0x1d   :  { %s3415_s1 = scalar_lea.vmem %s23_s17, 512  ;;  %p3420_p12 = scmp.lt.s32.totalorder %s23_s17, %s23_s17 }
  0x1e   :  { %p3416_p11 = scmp.ne.s32.totalorder %s23_s17, %s3415_s1  ;;  %p3421_p13 = scmp.lt.s32.totalorder %s3415_s1, %s3415_s1 }
  0x20   :  { %p3422_p0 = por %p3421_p13, %p3420_p12 }
  0x22   :  { %p3423_p1 = pnand %p3422_p0, %p3416_p11 }
  0x24   :  { %3426 = shalt.err (!%p3423_p1)
}
  0x25   :  { %25 = dma.hbm_to_vmem [thread:$0]  %s3618_s0, 512, %s23_s17, [#allocation4]  }
  0x26   :  { %s3427_s8 = scalar_lea.hbm %s3621_s3, 8192 }
  0x27   :  { %p3428_p2 = scmp.ne.s32.totalorder %s3621_s3, %s3427_s8  ;;  %p3431_p3 = scmp.lt.u32.totalorder %s3427_s8, %s3621_s3 }
  0x29   :  { %p3433_p4 = pnand %p3431_p3, %p3428_p2 }
  0x2b   :  { %3436 = shalt.err (!%p3433_p4)
}
  0x2c   :  { %s3437_s12 = scalar_lea.vmem %s46_s19, 8192  ;;  %p3442_p6 = scmp.lt.s32.totalorder %s46_s19, %s46_s19 }
  0x2d   :  { %p3438_p5 = scmp.ne.s32.totalorder %s46_s19, %s3437_s12  ;;  %p3443_p7 = scmp.lt.s32.totalorder %s3437_s12, %s3437_s12 }
  0x2f   :  { %p3444_p8 = por %p3443_p7, %p3442_p6 }
  0x31   :  { %p3445_p9 = pnand %p3444_p8, %p3438_p5 }
  0x33   :  { %3448 = shalt.err (!%p3445_p9)
}
  0x34   :  { %s3458_s0 = smov 128   ;;  %s3459_s13 = smov 8  }
  0x35   :  { %51 = dma.hbm_to_vmem [thread:$0]  %s3621_s3, 8192, %s46_s19, [#allocation6], %s3458_s0, %s3458_s0, %s3459_s13  }
  0x36   :  { %3449 = dma.done.wait [#allocation4], 512  }
  0x37   :  { %3450 = vsyncadd [#allocation4], 4294966784 }
  0x38   :  { %3451 = dma.done.wait [#allocation6], 40960  }
  0x39   :  { %3452 = vsyncadd [#allocation6], 4294926336  ;;  %v2895_v1 = vld [vmem:[#allocation5 + $0x4] ss:$16 sps:$4 sm:$0xff]   ;;  %v2899_v3 = vld [vmem:[#allocation5] ss:$16 sps:$4 sm:$0xff]  }
  0x3a   :  { %v2897_v2 = vld [vmem:[#allocation5 + $0x204] ss:$16 sps:$4 sm:$0xff]   ;;  %1657 = vmatprep.subr.bf16.mxu1 %v2895_v1  ;;  %v2900_v4 = vld [vmem:[#allocation5 + $0x200] ss:$16 sps:$4 sm:$0xff]   ;;  %v68_v49 = vld [vmem:[#allocation3 + $0x8] sm:$0xff]  ;;  %vm2519_vm6 = vcmask 7168  }
  0x3b   :  { %1698 = vmatprep.subr.bf16.mxu0 %v2897_v2  ;;  %v2901_v5 = vld [vmem:[#allocation5 + $0x24] ss:$16 sps:$4 sm:$0xff]   ;;  %1658 = vmatpush1.bf16.msra.mxu1 %v2899_v3  ;;  %v2905_v7 = vld [vmem:[#allocation5 + $0x20] ss:$16 sps:$4 sm:$0xff]   ;;  %v3541_v52 = vcombine.high %v68_v49, %v68_v49 }
  0x3c   :  { %1699 = vmatpush1.bf16.msra.mxu0 %v2900_v4  ;;  %v2903_v6 = vld [vmem:[#allocation5 + $0x224] ss:$16 sps:$4 sm:$0xff]   ;;  %1659 = vmatprep.subr.bf16.mxu1 %v2901_v5  ;;  %v2906_v8 = vld [vmem:[#allocation5 + $0x220] ss:$16 sps:$4 sm:$0xff]  }
  0x3d   :  { %1700 = vmatprep.subr.bf16.mxu0 %v2903_v6  ;;  %v2907_v9 = vld [vmem:[#allocation5 + $0x44] ss:$16 sps:$4 sm:$0xff]   ;;  %v2911_v11 = vld [vmem:[#allocation5 + $0x40] ss:$16 sps:$4 sm:$0xff]   ;;  %1730 = vmatprep.mubr.bf16.mxu0 %v3541_v52  ;;  %v3000_v6 = vld [vmem:[#allocation5 + $0xc] ss:$16 sps:$4 sm:$0xff]  }
  0x3e   :  { %v2909_v10 = vld [vmem:[#allocation5 + $0x244] ss:$16 sps:$4 sm:$0xff]   ;;  %v2912_v12 = vld [vmem:[#allocation5 + $0x240] ss:$16 sps:$4 sm:$0xff]  }
  0x3f   :  { %1660 = vmatpush1.bf16.msra.mxu1 %v2905_v7  ;;  %v2913_v13 = vld [vmem:[#allocation5 + $0x64] ss:$16 sps:$4 sm:$0xff]   ;;  %v2917_v15 = vld [vmem:[#allocation5 + $0x60] ss:$16 sps:$4 sm:$0xff]  }
  0x40   :  { %1701 = vmatpush1.bf16.msra.mxu0 %v2906_v8  ;;  %1661 = vmatprep.subr.bf16.mxu1 %v2907_v9  ;;  %v2915_v14 = vld [vmem:[#allocation5 + $0x264] ss:$16 sps:$4 sm:$0xff]   ;;  %v2918_v16 = vld [vmem:[#allocation5 + $0x260] ss:$16 sps:$4 sm:$0xff]   ;;  %v3547_v8 = vcombine.low %v68_v49, %v68_v49 }
  0x41   :  { %1702 = vmatprep.subr.bf16.mxu0 %v2909_v10  ;;  %v2919_v17 = vld [vmem:[#allocation5 + $0x84] ss:$16 sps:$4 sm:$0xff]   ;;  %v2923_v19 = vld [vmem:[#allocation5 + $0x80] ss:$16 sps:$4 sm:$0xff]   ;;  %v2998_v10 = vld [vmem:[#allocation5 + $0x8] ss:$16 sps:$4 sm:$0xff]  }
  0x42   :  { %v2921_v18 = vld [vmem:[#allocation5 + $0x284] ss:$16 sps:$4 sm:$0xff]   ;;  %v2924_v20 = vld [vmem:[#allocation5 + $0x280] ss:$16 sps:$4 sm:$0xff]  }
  0x43   :  { %1662 = vmatpush1.bf16.msra.mxu1 %v2911_v11  ;;  %v2925_v21 = vld [vmem:[#allocation5 + $0xa4] ss:$16 sps:$4 sm:$0xff]   ;;  %v2929_v23 = vld [vmem:[#allocation5 + $0xa0] ss:$16 sps:$4 sm:$0xff]  }
  0x44   :  { %1703 = vmatpush1.bf16.msra.mxu0 %v2912_v12  ;;  %1663 = vmatprep.subr.bf16.mxu1 %v2913_v13  ;;  %v2927_v22 = vld [vmem:[#allocation5 + $0x2a4] ss:$16 sps:$4 sm:$0xff]   ;;  %v2930_v24 = vld [vmem:[#allocation5 + $0x2a0] ss:$16 sps:$4 sm:$0xff]   ;;  %v3006_v12 = vld [vmem:[#allocation5 + $0x2c] ss:$16 sps:$4 sm:$0xff]  }
  0x45   :  { %1704 = vmatprep.subr.bf16.mxu0 %v2915_v14  ;;  %v2931_v25 = vld [vmem:[#allocation5 + $0xc4] ss:$16 sps:$4 sm:$0xff]   ;;  %v2935_v27 = vld [vmem:[#allocation5 + $0xc0] ss:$16 sps:$4 sm:$0xff]   ;;  %v3004_v14 = vld [vmem:[#allocation5 + $0x28] ss:$16 sps:$4 sm:$0xff]  }
  0x46   :  { %v2933_v26 = vld [vmem:[#allocation5 + $0x2c4] ss:$16 sps:$4 sm:$0xff]   ;;  %v2936_v28 = vld [vmem:[#allocation5 + $0x2c0] ss:$16 sps:$4 sm:$0xff]  }
  0x47   :  { %1664 = vmatpush1.bf16.msra.mxu1 %v2917_v15  ;;  %v2937_v29 = vld [vmem:[#allocation5 + $0xe4] ss:$16 sps:$4 sm:$0xff]   ;;  %v2941_v31 = vld [vmem:[#allocation5 + $0xe0] ss:$16 sps:$4 sm:$0xff]  }
  0x48   :  { %1705 = vmatpush1.bf16.msra.mxu0 %v2918_v16  ;;  %1665 = vmatprep.subr.bf16.mxu1 %v2919_v17  ;;  %v2939_v30 = vld [vmem:[#allocation5 + $0x2e4] ss:$16 sps:$4 sm:$0xff]   ;;  %v2942_v32 = vld [vmem:[#allocation5 + $0x2e0] ss:$16 sps:$4 sm:$0xff]   ;;  %v3012_v16 = vld [vmem:[#allocation5 + $0x4c] ss:$16 sps:$4 sm:$0xff]  }
  0x49   :  { %1706 = vmatprep.subr.bf16.mxu0 %v2921_v18  ;;  %v2943_v33 = vld [vmem:[#allocation5 + $0x104] ss:$16 sps:$4 sm:$0xff]   ;;  %v2947_v35 = vld [vmem:[#allocation5 + $0x100] ss:$16 sps:$4 sm:$0xff]   ;;  %v3010_v18 = vld [vmem:[#allocation5 + $0x48] ss:$16 sps:$4 sm:$0xff]  }
  0x4a   :  { %v2945_v34 = vld [vmem:[#allocation5 + $0x304] ss:$16 sps:$4 sm:$0xff]   ;;  %v2948_v36 = vld [vmem:[#allocation5 + $0x300] ss:$16 sps:$4 sm:$0xff]  }
  0x4b   :  { %1666 = vmatpush1.bf16.msra.mxu1 %v2923_v19  ;;  %v2949_v37 = vld [vmem:[#allocation5 + $0x124] ss:$16 sps:$4 sm:$0xff]   ;;  %v2953_v39 = vld [vmem:[#allocation5 + $0x120] ss:$16 sps:$4 sm:$0xff]  }
  0x4c   :  { %1707 = vmatpush1.bf16.msra.mxu0 %v2924_v20  ;;  %1667 = vmatprep.subr.bf16.mxu1 %v2925_v21  ;;  %v2951_v38 = vld [vmem:[#allocation5 + $0x324] ss:$16 sps:$4 sm:$0xff]   ;;  %v2954_v40 = vld [vmem:[#allocation5 + $0x320] ss:$16 sps:$4 sm:$0xff]   ;;  %v3018_v20 = vld [vmem:[#allocation5 + $0x6c] ss:$16 sps:$4 sm:$0xff]  }
  0x4d   :  { %1708 = vmatprep.subr.bf16.mxu0 %v2927_v22  ;;  %v2955_v41 = vld [vmem:[#allocation5 + $0x144] ss:$16 sps:$4 sm:$0xff]   ;;  %v2959_v43 = vld [vmem:[#allocation5 + $0x140] ss:$16 sps:$4 sm:$0xff]   ;;  %v3016_v22 = vld [vmem:[#allocation5 + $0x68] ss:$16 sps:$4 sm:$0xff]  }
  0x4e   :  { %v2957_v42 = vld [vmem:[#allocation5 + $0x344] ss:$16 sps:$4 sm:$0xff]   ;;  %v2960_v44 = vld [vmem:[#allocation5 + $0x340] ss:$16 sps:$4 sm:$0xff]  }
  0x4f   :  { %1668 = vmatpush1.bf16.msra.mxu1 %v2929_v23  ;;  %v2961_v45 = vld [vmem:[#allocation5 + $0x164] ss:$16 sps:$4 sm:$0xff]   ;;  %v2965_v50 = vld [vmem:[#allocation5 + $0x160] ss:$16 sps:$4 sm:$0xff]  }
  0x50   :  { %1709 = vmatpush1.bf16.msra.mxu0 %v2930_v24  ;;  %1669 = vmatprep.subr.bf16.mxu1 %v2931_v25  ;;  %v2963_v46 = vld [vmem:[#allocation5 + $0x364] ss:$16 sps:$4 sm:$0xff]   ;;  %v2966_v51 = vld [vmem:[#allocation5 + $0x360] ss:$16 sps:$4 sm:$0xff]   ;;  %v3024_v24 = vld [vmem:[#allocation5 + $0x8c] ss:$16 sps:$4 sm:$0xff]  }
  0x51   :  { %1710 = vmatprep.subr.bf16.mxu0 %v2933_v26  ;;  %v67_v47 = vld [vmem:[#allocation3] sm:$0xff]  ;;  %v3022_v26 = vld [vmem:[#allocation5 + $0x88] ss:$16 sps:$4 sm:$0xff]  }
  0x52   :  { %v3539_v48 = vcombine.high %v67_v47, %v67_v47  ;;  %v2967_v53 = vld [vmem:[#allocation5 + $0x184] ss:$16 sps:$4 sm:$0xff]   ;;  %v2971_v55 = vld [vmem:[#allocation5 + $0x180] ss:$16 sps:$4 sm:$0xff]   ;;  %v3545_v7 = vcombine.low %v67_v47, %v67_v47 }
  0x53   :  { %1670 = vmatpush1.bf16.msra.mxu1 %v2935_v27  ;;  %v2969_v54 = vld [vmem:[#allocation5 + $0x384] ss:$16 sps:$4 sm:$0xff]   ;;  %v2972_v56 = vld [vmem:[#allocation5 + $0x380] ss:$16 sps:$4 sm:$0xff]  }
  0x54   :  { %1711 = vmatpush1.bf16.msra.mxu0 %v2936_v28  ;;  %1671 = vmatprep.subr.bf16.mxu1 %v2937_v29  ;;  %v2973_v57 = vld [vmem:[#allocation5 + $0x1a4] ss:$16 sps:$4 sm:$0xff]   ;;  %v2977_v59 = vld [vmem:[#allocation5 + $0x1a0] ss:$16 sps:$4 sm:$0xff]   ;;  %v3030_v28 = vld [vmem:[#allocation5 + $0xac] ss:$16 sps:$4 sm:$0xff]  }
  0x55   :  { %1712 = vmatprep.subr.bf16.mxu0 %v2939_v30  ;;  %1689 = vmatprep.mubr.bf16.mxu1 %v3539_v48  ;;  %v2975_v58 = vld [vmem:[#allocation5 + $0x3a4] ss:$16 sps:$4 sm:$0xff]   ;;  %v2978_v60 = vld [vmem:[#allocation5 + $0x3a0] ss:$16 sps:$4 sm:$0xff]   ;;  %v3028_v30 = vld [vmem:[#allocation5 + $0xa8] ss:$16 sps:$4 sm:$0xff]  }
  0x56   :  { %v2979_v61 = vld [vmem:[#allocation5 + $0x1c4] ss:$16 sps:$4 sm:$0xff]   ;;  %v2983_v63 = vld [vmem:[#allocation5 + $0x1c0] ss:$16 sps:$4 sm:$0xff]  }
  0x57   :  { %1672 = vmatpush1.bf16.msra.mxu1 %v2941_v31  ;;  %v2981_v62 = vld [vmem:[#allocation5 + $0x3c4] ss:$16 sps:$4 sm:$0xff]   ;;  %v2984_v0 = vld [vmem:[#allocation5 + $0x3c0] ss:$16 sps:$4 sm:$0xff]  }
  0x58   :  { %1713 = vmatpush1.bf16.msra.mxu0 %v2942_v32  ;;  %1673 = vmatprep.subr.bf16.mxu1 %v2943_v33  ;;  %v2985_v1 = vld [vmem:[#allocation5 + $0x1e4] ss:$16 sps:$4 sm:$0xff]   ;;  %v2989_v3 = vld [vmem:[#allocation5 + $0x1e0] ss:$16 sps:$4 sm:$0xff]   ;;  %v3036_v32 = vld [vmem:[#allocation5 + $0xcc] ss:$16 sps:$4 sm:$0xff]  }
  0x59   :  { %1714 = vmatprep.subr.bf16.mxu0 %v2945_v34  ;;  %v2987_v2 = vld [vmem:[#allocation5 + $0x3e4] ss:$16 sps:$4 sm:$0xff]   ;;  %v2990_v4 = vld [vmem:[#allocation5 + $0x3e0] ss:$16 sps:$4 sm:$0xff]  }
  0x5a   :  { %v2997_v5 = vld [vmem:[#allocation5 + $0x404] ss:$16 sps:$4 sm:$0xff]   ;;  %v2995_v9 = vld [vmem:[#allocation5 + $0x400] ss:$16 sps:$4 sm:$0xff]  }
  0x5b   :  { %1674 = vmatpush1.bf16.msra.mxu1 %v2947_v35  ;;  %v3003_v11 = vld [vmem:[#allocation5 + $0x424] ss:$16 sps:$4 sm:$0xff]   ;;  %v3001_v13 = vld [vmem:[#allocation5 + $0x420] ss:$16 sps:$4 sm:$0xff]  }
  0x5c   :  { %1715 = vmatpush1.bf16.msra.mxu0 %v2948_v36  ;;  %1675 = vmatprep.subr.bf16.mxu1 %v2949_v37  ;;  %v3009_v15 = vld [vmem:[#allocation5 + $0x444] ss:$16 sps:$4 sm:$0xff]   ;;  %v3007_v17 = vld [vmem:[#allocation5 + $0x440] ss:$16 sps:$4 sm:$0xff]   ;;  %v3034_v36 = vld [vmem:[#allocation5 + $0xc8] ss:$16 sps:$4 sm:$0xff]  }
  0x5d   :  { %1716 = vmatprep.subr.bf16.mxu0 %v2951_v38  ;;  %v3015_v19 = vld [vmem:[#allocation5 + $0x464] ss:$16 sps:$4 sm:$0xff]   ;;  %v3013_v21 = vld [vmem:[#allocation5 + $0x460] ss:$16 sps:$4 sm:$0xff]   ;;  %v3042_v38 = vld [vmem:[#allocation5 + $0xec] ss:$16 sps:$4 sm:$0xff]  }
  0x5e   :  { %v3021_v23 = vld [vmem:[#allocation5 + $0x484] ss:$16 sps:$4 sm:$0xff]   ;;  %v3019_v25 = vld [vmem:[#allocation5 + $0x480] ss:$16 sps:$4 sm:$0xff]  }
  0x5f   :  { %1676 = vmatpush1.bf16.msra.mxu1 %v2953_v39  ;;  %v3027_v27 = vld [vmem:[#allocation5 + $0x4a4] ss:$16 sps:$4 sm:$0xff]   ;;  %v3025_v29 = vld [vmem:[#allocation5 + $0x4a0] ss:$16 sps:$4 sm:$0xff]  }
  0x60   :  { %1717 = vmatpush1.bf16.msra.mxu0 %v2954_v40  ;;  %1677 = vmatprep.subr.bf16.mxu1 %v2955_v41  ;;  %v3033_v31 = vld [vmem:[#allocation5 + $0x4c4] ss:$16 sps:$4 sm:$0xff]   ;;  %v3031_v34 = vld [vmem:[#allocation5 + $0x4c0] ss:$16 sps:$4 sm:$0xff]   ;;  %v3040_v40 = vld [vmem:[#allocation5 + $0xe8] ss:$16 sps:$4 sm:$0xff]  }
  0x61   :  { %1718 = vmatprep.subr.bf16.mxu0 %v2957_v42  ;;  %v3552_v33 = vld [vmem:[#allocation3 + $0x10] sm:$0xff]  ;;  %v3048_v42 = vld [vmem:[#allocation5 + $0x10c] ss:$16 sps:$4 sm:$0xff]  }
  0x62   :  { %v3556_v35 = vcombine.high %v3552_v33, %v3552_v33  ;;  %v3039_v37 = vld [vmem:[#allocation5 + $0x4e4] ss:$16 sps:$4 sm:$0xff]   ;;  %v3037_v39 = vld [vmem:[#allocation5 + $0x4e0] ss:$16 sps:$4 sm:$0xff]  }
  0x63   :  { %1678 = vmatpush1.bf16.msra.mxu1 %v2959_v43  ;;  %v3045_v41 = vld [vmem:[#allocation5 + $0x504] ss:$16 sps:$4 sm:$0xff]   ;;  %v3043_v43 = vld [vmem:[#allocation5 + $0x500] ss:$16 sps:$4 sm:$0xff]  }
  0x64   :  { %1719 = vmatpush1.bf16.msra.mxu0 %v2960_v44  ;;  %1679 = vmatprep.subr.bf16.mxu1 %v2961_v45  ;;  %v3046_v44 = vld [vmem:[#allocation5 + $0x108] ss:$16 sps:$4 sm:$0xff]   ;;  %v3051_v45 = vld [vmem:[#allocation5 + $0x524] ss:$16 sps:$4 sm:$0xff]   ;;  %v3049_v47 = vld [vmem:[#allocation5 + $0x520] ss:$16 sps:$4 sm:$0xff]  }
  0x65   :  { %1720 = vmatprep.subr.bf16.mxu0 %v2963_v46  ;;  %v3054_v46 = vld [vmem:[#allocation5 + $0x12c] ss:$16 sps:$4 sm:$0xff]   ;;  %v3057_v49 = vld [vmem:[#allocation5 + $0x544] ss:$16 sps:$4 sm:$0xff]  }
  0x67   :  { %1680 = vmatpush1.bf16.msra.mxu1 %v2965_v50  ;;  %v3060_v50 = vld [vmem:[#allocation5 + $0x14c] ss:$16 sps:$4 sm:$0xff]  }
  0x68   :  { %1721 = vmatpush1.bf16.msra.mxu0 %v2966_v51  ;;  %1681 = vmatprep.subr.bf16.mxu1 %v2967_v53  ;;  %v3055_v51 = vld [vmem:[#allocation5 + $0x540] ss:$16 sps:$4 sm:$0xff]   ;;  %v3058_v53 = vld [vmem:[#allocation5 + $0x148] ss:$16 sps:$4 sm:$0xff]  }
  0x69   :  { %1722 = vmatprep.subr.bf16.mxu0 %v2969_v54  ;;  %v3063_v54 = vld [vmem:[#allocation5 + $0x564] ss:$16 sps:$4 sm:$0xff]  }
  0x6b   :  { %1682 = vmatpush1.bf16.msra.mxu1 %v2971_v55  ;;  %v3066_v55 = vld [vmem:[#allocation5 + $0x16c] ss:$16 sps:$4 sm:$0xff]  }
  0x6c   :  { %1723 = vmatpush1.bf16.msra.mxu0 %v2972_v56  ;;  %1683 = vmatprep.subr.bf16.mxu1 %v2973_v57  ;;  %v3061_v56 = vld [vmem:[#allocation5 + $0x560] ss:$16 sps:$4 sm:$0xff]   ;;  %v3064_v57 = vld [vmem:[#allocation5 + $0x168] ss:$16 sps:$4 sm:$0xff]  }
  0x6d   :  { %1724 = vmatprep.subr.bf16.mxu0 %v2975_v58  ;;  %v3069_v58 = vld [vmem:[#allocation5 + $0x584] ss:$16 sps:$4 sm:$0xff]  }
  0x6f   :  { %1684 = vmatpush1.bf16.msra.mxu1 %v2977_v59  ;;  %v3072_v59 = vld [vmem:[#allocation5 + $0x18c] ss:$16 sps:$4 sm:$0xff]  }
  0x70   :  { %1725 = vmatpush1.bf16.msra.mxu0 %v2978_v60  ;;  %1685 = vmatprep.subr.bf16.mxu1 %v2979_v61  ;;  %v3067_v60 = vld [vmem:[#allocation5 + $0x580] ss:$16 sps:$4 sm:$0xff]   ;;  %v3070_v61 = vld [vmem:[#allocation5 + $0x188] ss:$16 sps:$4 sm:$0xff]  }
  0x71   :  { %1726 = vmatprep.subr.bf16.mxu0 %v2981_v62  ;;  %v3075_v62 = vld [vmem:[#allocation5 + $0x5a4] ss:$16 sps:$4 sm:$0xff]  }
  0x73   :  { %1686 = vmatpush1.bf16.msra.mxu1 %v2983_v63  ;;  %v3078_v63 = vld [vmem:[#allocation5 + $0x1ac] ss:$16 sps:$4 sm:$0xff]  }
  0x74   :  { %1727 = vmatpush1.bf16.msra.mxu0 %v2984_v0  ;;  %1687 = vmatprep.subr.bf16.mxu1 %v2985_v1  ;;  %v3073_v0 = vld [vmem:[#allocation5 + $0x5a0] ss:$16 sps:$4 sm:$0xff]   ;;  %v3076_v1 = vld [vmem:[#allocation5 + $0x1a8] ss:$16 sps:$4 sm:$0xff]  }
  0x75   :  { %1728 = vmatprep.subr.bf16.mxu0 %v2987_v2  ;;  %v3081_v2 = vld [vmem:[#allocation5 + $0x5c4] ss:$16 sps:$4 sm:$0xff]  }
  0x77   :  { %1688 = vmatpush1.bf16.msra.mxu1 %v2989_v3  ;;  %v3084_v3 = vld [vmem:[#allocation5 + $0x1cc] ss:$16 sps:$4 sm:$0xff]  }
  0x78   :  { %1729 = vmatpush1.bf16.msra.mxu0 %v2990_v4  ;;  %1821 = vmatprep.subr.bf16.mxu1 %v3000_v6  ;;  %v3079_v4 = vld [vmem:[#allocation5 + $0x5c0] ss:$16 sps:$4 sm:$0xff]   ;;  %v3087_v6 = vld [vmem:[#allocation5 + $0x5e4] ss:$16 sps:$4 sm:$0xff]  }
  0x79   :  { %1739 = vmatprep.subr.bf16.mxu0 %v2997_v5  ;;  %v3082_v5 = vld [vmem:[#allocation5 + $0x1c8] ss:$16 sps:$4 sm:$0xff]  }
  0x7a   :  { %1690 = vmatmul.mubr.bf16.vlgmr.msra.gmra.mrb[0].mxu1 %v3545_v7 }
  0x7b   :  { %1731 = vmatmul.mubr.bf16.vlgmr.msra.gmra.mrb[0].mxu0 %v3547_v8  ;;  %1822 = vmatpush1.bf16.msra.mxu1 %v2998_v10  ;;  %v3085_v10 = vld [vmem:[#allocation5 + $0x5e0] ss:$16 sps:$4 sm:$0xff]  }
  0x7c   :  { %1740 = vmatpush1.bf16.msra.mxu0 %v2995_v9  ;;  %1823 = vmatprep.subr.bf16.mxu1 %v3006_v12  ;;  %v3090_v9 = vld [vmem:[#allocation5 + $0x1ec] ss:$16 sps:$4 sm:$0xff]   ;;  %v3095_v12 = vld [vmem:[#allocation5 + $0x604] ss:$16 sps:$4 sm:$0xff]  }
  0x7d   :  { %1741 = vmatprep.subr.bf16.mxu0 %v3003_v11  ;;  %1853 = vmatprep.mubr.bf16.mxu1 %v3539_v48  ;;  %v3052_v48 = vld [vmem:[#allocation5 + $0x128] ss:$16 sps:$4 sm:$0xff]  }
  0x7e   :  { %1771 = vmatprep.mubr.bf16.mxu0 %v3556_v35  ;;  %v3088_v11 = vld [vmem:[#allocation5 + $0x1e8] ss:$16 sps:$4 sm:$0xff]  }
  0x7f   :  { %1824 = vmatpush1.bf16.msra.mxu1 %v3004_v14  ;;  %v3561_v14 = vcombine.low %v3552_v33, %v3552_v33  ;;  %v3120_v33 = vld [vmem:[#allocation5 + $0x288] ss:$16 sps:$4 sm:$0xff]  }
  0x80   :  { %1742 = vmatpush1.bf16.msra.mxu0 %v3001_v13  ;;  %1825 = vmatprep.subr.bf16.mxu1 %v3012_v16  ;;  %v3098_v13 = vld [vmem:[#allocation5 + $0x20c] ss:$16 sps:$4 sm:$0xff]   ;;  %v3096_v16 = vld [vmem:[#allocation5 + $0x208] ss:$16 sps:$4 sm:$0xff]  }
  0x81   :  { %1743 = vmatprep.subr.bf16.mxu0 %v3009_v15  ;;  %v3093_v15 = vld [vmem:[#allocation5 + $0x600] ss:$16 sps:$4 sm:$0xff]  }
  0x83   :  { %1826 = vmatpush1.bf16.msra.mxu1 %v3010_v18  ;;  %v3104_v18 = vld [vmem:[#allocation5 + $0x22c] ss:$16 sps:$4 sm:$0xff]  }
  0x84   :  { %1744 = vmatpush1.bf16.msra.mxu0 %v3007_v17  ;;  %1827 = vmatprep.subr.bf16.mxu1 %v3018_v20  ;;  %v3101_v17 = vld [vmem:[#allocation5 + $0x624] ss:$16 sps:$4 sm:$0xff]  }
  0x85   :  { %1745 = vmatprep.subr.bf16.mxu0 %v3015_v19  ;;  %v3563_v19 = vld [vmem:[#allocation3 + $0x18] sm:$0xff] }
  0x86   :  { %v3567_v20 = vcombine.high %v3563_v19, %v3563_v19 }
  0x87   :  { %1828 = vmatpush1.bf16.msra.mxu1 %v3016_v22  ;;  %v3102_v22 = vld [vmem:[#allocation5 + $0x228] ss:$16 sps:$4 sm:$0xff]  }
  0x88   :  { %1746 = vmatpush1.bf16.msra.mxu0 %v3013_v21  ;;  %1829 = vmatprep.subr.bf16.mxu1 %v3024_v24  ;;  %v3099_v21 = vld [vmem:[#allocation5 + $0x620] ss:$16 sps:$4 sm:$0xff]   ;;  %v3110_v24 = vld [vmem:[#allocation5 + $0x24c] ss:$16 sps:$4 sm:$0xff]  }
  0x89   :  { %1747 = vmatprep.subr.bf16.mxu0 %v3021_v23  ;;  %v3107_v23 = vld [vmem:[#allocation5 + $0x644] ss:$16 sps:$4 sm:$0xff]  }
  0x8b   :  { %1830 = vmatpush1.bf16.msra.mxu1 %v3022_v26  ;;  %v3108_v26 = vld [vmem:[#allocation5 + $0x248] ss:$16 sps:$4 sm:$0xff]  }
  0x8c   :  { %1748 = vmatpush1.bf16.msra.mxu0 %v3019_v25  ;;  %1831 = vmatprep.subr.bf16.mxu1 %v3030_v28  ;;  %v3105_v25 = vld [vmem:[#allocation5 + $0x640] ss:$16 sps:$4 sm:$0xff]  }
  0x8d   :  { %1749 = vmatprep.subr.bf16.mxu0 %v3027_v27  ;;  %v3113_v27 = vld [vmem:[#allocation5 + $0x664] ss:$16 sps:$4 sm:$0xff]   ;;  %v3111_v28 = vld [vmem:[#allocation5 + $0x660] ss:$16 sps:$4 sm:$0xff]  }
  0x8f   :  { %1832 = vmatpush1.bf16.msra.mxu1 %v3028_v30  ;;  %v3119_v30 = vld [vmem:[#allocation5 + $0x684] ss:$16 sps:$4 sm:$0xff]  }
  0x90   :  { %1750 = vmatpush1.bf16.msra.mxu0 %v3025_v29  ;;  %1833 = vmatprep.subr.bf16.mxu1 %v3036_v32  ;;  %v3114_v29 = vld [vmem:[#allocation5 + $0x268] ss:$16 sps:$4 sm:$0xff]   ;;  %v3117_v32 = vld [vmem:[#allocation5 + $0x680] ss:$16 sps:$4 sm:$0xff]  }
  0x91   :  { %1751 = vmatprep.subr.bf16.mxu0 %v3033_v31  ;;  %v3122_v31 = vld [vmem:[#allocation5 + $0x28c] ss:$16 sps:$4 sm:$0xff]  }
  0x93   :  { %1834 = vmatpush1.bf16.msra.mxu1 %v3034_v36  ;;  %v3123_v36 = vld [vmem:[#allocation5 + $0x6a0] ss:$16 sps:$4 sm:$0xff]  }
  0x94   :  { %1752 = vmatpush1.bf16.msra.mxu0 %v3031_v34  ;;  %1835 = vmatprep.subr.bf16.mxu1 %v3042_v38  ;;  %v3128_v34 = vld [vmem:[#allocation5 + $0x2ac] ss:$16 sps:$4 sm:$0xff]   ;;  %v3131_v38 = vld [vmem:[#allocation5 + $0x6c4] ss:$16 sps:$4 sm:$0xff]  }
  0x95   :  { %1753 = vmatprep.subr.bf16.mxu0 %v3039_v37  ;;  %v3126_v37 = vld [vmem:[#allocation5 + $0x2a8] ss:$16 sps:$4 sm:$0xff]  }
  0x97   :  { %1836 = vmatpush1.bf16.msra.mxu1 %v3040_v40  ;;  %v3129_v40 = vld [vmem:[#allocation5 + $0x6c0] ss:$16 sps:$4 sm:$0xff]  }
  0x98   :  { %1754 = vmatpush1.bf16.msra.mxu0 %v3037_v39  ;;  %1837 = vmatprep.subr.bf16.mxu1 %v3048_v42  ;;  %v3134_v39 = vld [vmem:[#allocation5 + $0x2cc] ss:$16 sps:$4 sm:$0xff]   ;;  %v3137_v42 = vld [vmem:[#allocation5 + $0x6e4] ss:$16 sps:$4 sm:$0xff]  }
  0x99   :  { %1755 = vmatprep.subr.bf16.mxu0 %v3045_v41  ;;  %v3132_v41 = vld [vmem:[#allocation5 + $0x2c8] ss:$16 sps:$4 sm:$0xff]  }
  0x9b   :  { %1838 = vmatpush1.bf16.msra.mxu1 %v3046_v44  ;;  %v3135_v44 = vld [vmem:[#allocation5 + $0x6e0] ss:$16 sps:$4 sm:$0xff]  }
  0x9c   :  { %1756 = vmatpush1.bf16.msra.mxu0 %v3043_v43  ;;  %1839 = vmatprep.subr.bf16.mxu1 %v3054_v46  ;;  %v3140_v43 = vld [vmem:[#allocation5 + $0x2ec] ss:$16 sps:$4 sm:$0xff]   ;;  %v3143_v46 = vld [vmem:[#allocation5 + $0x704] ss:$16 sps:$4 sm:$0xff]  }
  0x9d   :  { %1757 = vmatprep.subr.bf16.mxu0 %v3051_v45  ;;  %v3138_v45 = vld [vmem:[#allocation5 + $0x2e8] ss:$16 sps:$4 sm:$0xff]  }
  0x9f   :  { %1840 = vmatpush1.bf16.msra.mxu1 %v3052_v48  ;;  %v3141_v48 = vld [vmem:[#allocation5 + $0x700] ss:$16 sps:$4 sm:$0xff]  }
  0xa0   :  { %1758 = vmatpush1.bf16.msra.mxu0 %v3049_v47  ;;  %1841 = vmatprep.subr.bf16.mxu1 %v3060_v50  ;;  %v3146_v47 = vld [vmem:[#allocation5 + $0x30c] ss:$16 sps:$4 sm:$0xff]   ;;  %v3149_v50 = vld [vmem:[#allocation5 + $0x724] ss:$16 sps:$4 sm:$0xff]  }
  0xa1   :  { %1759 = vmatprep.subr.bf16.mxu0 %v3057_v49  ;;  %v3144_v49 = vld [vmem:[#allocation5 + $0x308] ss:$16 sps:$4 sm:$0xff]  }
  0xa3   :  { %1842 = vmatpush1.bf16.msra.mxu1 %v3058_v53  ;;  %v3147_v53 = vld [vmem:[#allocation5 + $0x720] ss:$16 sps:$4 sm:$0xff]  }
  0xa4   :  { %1760 = vmatpush1.bf16.msra.mxu0 %v3055_v51  ;;  %1843 = vmatprep.subr.bf16.mxu1 %v3066_v55  ;;  %v3152_v51 = vld [vmem:[#allocation5 + $0x32c] ss:$16 sps:$4 sm:$0xff]   ;;  %v3155_v55 = vld [vmem:[#allocation5 + $0x744] ss:$16 sps:$4 sm:$0xff]  }
  0xa5   :  { %1761 = vmatprep.subr.bf16.mxu0 %v3063_v54  ;;  %v3150_v54 = vld [vmem:[#allocation5 + $0x328] ss:$16 sps:$4 sm:$0xff]  }
  0xa7   :  { %1844 = vmatpush1.bf16.msra.mxu1 %v3064_v57  ;;  %v3153_v57 = vld [vmem:[#allocation5 + $0x740] ss:$16 sps:$4 sm:$0xff]  }
  0xa8   :  { %1762 = vmatpush1.bf16.msra.mxu0 %v3061_v56  ;;  %1845 = vmatprep.subr.bf16.mxu1 %v3072_v59  ;;  %v3158_v56 = vld [vmem:[#allocation5 + $0x34c] ss:$16 sps:$4 sm:$0xff]   ;;  %v3161_v59 = vld [vmem:[#allocation5 + $0x764] ss:$16 sps:$4 sm:$0xff]  }
  0xa9   :  { %1763 = vmatprep.subr.bf16.mxu0 %v3069_v58  ;;  %v3156_v58 = vld [vmem:[#allocation5 + $0x348] ss:$16 sps:$4 sm:$0xff]  }
  0xab   :  { %1846 = vmatpush1.bf16.msra.mxu1 %v3070_v61  ;;  %v3159_v61 = vld [vmem:[#allocation5 + $0x760] ss:$16 sps:$4 sm:$0xff]  }
  0xac   :  { %1764 = vmatpush1.bf16.msra.mxu0 %v3067_v60  ;;  %1847 = vmatprep.subr.bf16.mxu1 %v3078_v63  ;;  %v3164_v60 = vld [vmem:[#allocation5 + $0x36c] ss:$16 sps:$4 sm:$0xff]   ;;  %v3167_v63 = vld [vmem:[#allocation5 + $0x784] ss:$16 sps:$4 sm:$0xff]  }
  0xad   :  { %1765 = vmatprep.subr.bf16.mxu0 %v3075_v62  ;;  %v3162_v62 = vld [vmem:[#allocation5 + $0x368] ss:$16 sps:$4 sm:$0xff]  }
  0xaf   :  { %1848 = vmatpush1.bf16.msra.mxu1 %v3076_v1  ;;  %v3165_v1 = vld [vmem:[#allocation5 + $0x780] ss:$16 sps:$4 sm:$0xff]  }
  0xb0   :  { %1766 = vmatpush1.bf16.msra.mxu0 %v3073_v0  ;;  %1849 = vmatprep.subr.bf16.mxu1 %v3084_v3  ;;  %v3170_v0 = vld [vmem:[#allocation5 + $0x38c] ss:$16 sps:$4 sm:$0xff]   ;;  %v3173_v3 = vld [vmem:[#allocation5 + $0x7a4] ss:$16 sps:$4 sm:$0xff]  }
  0xb1   :  { %1767 = vmatprep.subr.bf16.mxu0 %v3081_v2  ;;  %v3168_v2 = vld [vmem:[#allocation5 + $0x388] ss:$16 sps:$4 sm:$0xff]  }
  0xb3   :  { %1850 = vmatpush1.bf16.msra.mxu1 %v3082_v5  ;;  %v3171_v5 = vld [vmem:[#allocation5 + $0x7a0] ss:$16 sps:$4 sm:$0xff]  }
  0xb4   :  { %1768 = vmatpush1.bf16.msra.mxu0 %v3079_v4  ;;  %1851 = vmatprep.subr.bf16.mxu1 %v3090_v9  ;;  %v3176_v4 = vld [vmem:[#allocation5 + $0x3ac] ss:$16 sps:$4 sm:$0xff]   ;;  %v3179_v9 = vld [vmem:[#allocation5 + $0x7c4] ss:$16 sps:$4 sm:$0xff]  }
  0xb5   :  { %1769 = vmatprep.subr.bf16.mxu0 %v3087_v6  ;;  %v3174_v6 = vld [vmem:[#allocation5 + $0x3a8] ss:$16 sps:$4 sm:$0xff]  }
  0xb7   :  { %1852 = vmatpush1.bf16.msra.mxu1 %v3088_v11  ;;  %v3177_v11 = vld [vmem:[#allocation5 + $0x7c0] ss:$16 sps:$4 sm:$0xff]  }
  0xb8   :  { %1770 = vmatpush1.bf16.msra.mxu0 %v3085_v10  ;;  %1862 = vmatprep.subr.bf16.mxu1 %v3098_v13  ;;  %v3182_v10 = vld [vmem:[#allocation5 + $0x3cc] ss:$16 sps:$4 sm:$0xff]   ;;  %v3185_v13 = vld [vmem:[#allocation5 + $0x7e4] ss:$16 sps:$4 sm:$0xff]  }
  0xb9   :  { %1780 = vmatprep.subr.bf16.mxu0 %v3095_v12  ;;  %v3180_v12 = vld [vmem:[#allocation5 + $0x3c8] ss:$16 sps:$4 sm:$0xff]  }
  0xba   :  { %1854 = vmatmul.mubr.bf16.vlgmr.msra.gmra.mrb[4].mxu1 %v3545_v7  ;;  %v3116_v7 = vld [vmem:[#allocation5 + $0x26c] ss:$16 sps:$4 sm:$0xff]  }
  0xbb   :  { %1772 = vmatmul.mubr.bf16.vlgmr.msra.gmra.mrb[0].mxu0 %v3561_v14  ;;  %1863 = vmatpush1.bf16.msra.mxu1 %v3096_v16  ;;  %v3183_v16 = vld [vmem:[#allocation5 + $0x7e0] ss:$16 sps:$4 sm:$0xff]  }
  0xbc   :  { %1781 = vmatpush1.bf16.msra.mxu0 %v3093_v15  ;;  %1864 = vmatprep.subr.bf16.mxu1 %v3104_v18  ;;  %v3188_v15 = vld [vmem:[#allocation5 + $0x3ec] ss:$16 sps:$4 sm:$0xff]  }
  0xbd   :  { %1782 = vmatprep.subr.bf16.mxu0 %v3101_v17  ;;  %1812 = vmatprep.mubr.bf16.mxu0 %v3567_v20  ;;  %v3186_v17 = vld [vmem:[#allocation5 + $0x3e8] ss:$16 sps:$4 sm:$0xff]   ;;  %v3193_v18 = vld [vmem:[#allocation5 + $0x40c] ss:$16 sps:$4 sm:$0xff]  }
  0xbe   :  { %1894 = vmatprep.mubr.bf16.mxu1 %v3541_v52  ;;  %v3125_v52 = vld [vmem:[#allocation5 + $0x6a4] ss:$16 sps:$4 sm:$0xff]  }
  0xbf   :  { %1865 = vmatpush1.bf16.msra.mxu1 %v3102_v22  ;;  %v3575_v22 = vcombine.low %v3563_v19, %v3563_v19  ;;  %v3290_v19 = vld [vmem:[#allocation7 + $0x10] ss:$8 sps:$4 sm:$0xff]  }
  0xc0   :  { %1783 = vmatpush1.bf16.msra.mxu0 %v3099_v21  ;;  %1866 = vmatprep.subr.bf16.mxu1 %v3110_v24  ;;  %v3191_v21 = vld [vmem:[#allocation5 + $0x408] ss:$16 sps:$4 sm:$0xff]  }
  0xc1   :  { %1784 = vmatprep.subr.bf16.mxu0 %v3107_v23  ;;  %v3196_v23 = vld [vmem:[#allocation5 + $0x42c] ss:$16 sps:$4 sm:$0xff]   ;;  %v3287_v24 = vld [vmem:[#allocation7] ss:$8 sps:$4 sm:$0xff]  }
  0xc3   :  { %1867 = vmatpush1.bf16.msra.mxu1 %v3108_v26  ;;  %v3194_v26 = vld [vmem:[#allocation5 + $0x428] ss:$16 sps:$4 sm:$0xff]  }
  0xc4   :  { %1785 = vmatpush1.bf16.msra.mxu0 %v3105_v25  ;;  %1868 = vmatprep.subr.bf16.mxu1 %v3116_v7  ;;  %v3289_v25 = vld [vmem:[#allocation7 + $0x4] ss:$8 sps:$4 sm:$0xff]  }
  0xc5   :  { %1786 = vmatprep.subr.bf16.mxu0 %v3113_v27  ;;  %v3292_v27 = vld [vmem:[#allocation7 + $0x14] ss:$8 sps:$4 sm:$0xff]  }
  0xc6   :  { %v3199_v7 = vld [vmem:[#allocation5 + $0x44c] ss:$16 sps:$4 sm:$0xff]  }
  0xc7   :  { %1869 = vmatpush1.bf16.msra.mxu1 %v3114_v29  ;;  %v3197_v29 = vld [vmem:[#allocation5 + $0x448] ss:$16 sps:$4 sm:$0xff]  }
  0xc8   :  { %1787 = vmatpush1.bf16.msra.mxu0 %v3111_v28  ;;  %1870 = vmatprep.subr.bf16.mxu1 %v3122_v31  ;;  %v3295_v28 = vld [vmem:[#allocation7 + $0x24] ss:$8 sps:$4 sm:$0xff]   ;;  %v3298_v31 = vld [vmem:[#allocation7 + $0x34] ss:$8 sps:$4 sm:$0xff]  }
  0xc9   :  { %1788 = vmatprep.subr.bf16.mxu0 %v3119_v30  ;;  %v3202_v30 = vld [vmem:[#allocation5 + $0x46c] ss:$16 sps:$4 sm:$0xff]  }
  0xcb   :  { %1871 = vmatpush1.bf16.msra.mxu1 %v3120_v33  ;;  %v3296_v33 = vld [vmem:[#allocation7 + $0x30] ss:$8 sps:$4 sm:$0xff]  }
  0xcc   :  { %1789 = vmatpush1.bf16.msra.mxu0 %v3117_v32  ;;  %1872 = vmatprep.subr.bf16.mxu1 %v3128_v34  ;;  %v3200_v32 = vld [vmem:[#allocation5 + $0x468] ss:$16 sps:$4 sm:$0xff]  }
  0xcd   :  { %1790 = vmatprep.subr.bf16.mxu0 %v3125_v52  ;;  %v3301_v52 = vld [vmem:[#allocation7 + $0x44] ss:$8 sps:$4 sm:$0xff]   ;;  %v3203_v34 = vld [vmem:[#allocation5 + $0x488] ss:$16 sps:$4 sm:$0xff]  }
  0xcf   :  { %1873 = vmatpush1.bf16.msra.mxu1 %v3126_v37  ;;  %v3299_v37 = vld [vmem:[#allocation7 + $0x40] ss:$8 sps:$4 sm:$0xff]  }
  0xd0   :  { %1791 = vmatpush1.bf16.msra.mxu0 %v3123_v36  ;;  %1874 = vmatprep.subr.bf16.mxu1 %v3134_v39  ;;  %v3208_v36 = vld [vmem:[#allocation5 + $0x4ac] ss:$16 sps:$4 sm:$0xff]   ;;  %v3206_v39 = vld [vmem:[#allocation5 + $0x4a8] ss:$16 sps:$4 sm:$0xff]  }
  0xd1   :  { %1792 = vmatprep.subr.bf16.mxu0 %v3131_v38  ;;  %v3304_v38 = vld [vmem:[#allocation7 + $0x54] ss:$8 sps:$4 sm:$0xff]  }
  0xd3   :  { %1875 = vmatpush1.bf16.msra.mxu1 %v3132_v41  ;;  %v3302_v41 = vld [vmem:[#allocation7 + $0x50] ss:$8 sps:$4 sm:$0xff]  }
  0xd4   :  { %1793 = vmatpush1.bf16.msra.mxu0 %v3129_v40  ;;  %1876 = vmatprep.subr.bf16.mxu1 %v3140_v43  ;;  %v3211_v40 = vld [vmem:[#allocation5 + $0x4cc] ss:$16 sps:$4 sm:$0xff]   ;;  %v3209_v43 = vld [vmem:[#allocation5 + $0x4c8] ss:$16 sps:$4 sm:$0xff]  }
  0xd5   :  { %1794 = vmatprep.subr.bf16.mxu0 %v3137_v42  ;;  %v3307_v42 = vld [vmem:[#allocation7 + $0x64] ss:$8 sps:$4 sm:$0xff]  }
  0xd7   :  { %1877 = vmatpush1.bf16.msra.mxu1 %v3138_v45  ;;  %v3305_v45 = vld [vmem:[#allocation7 + $0x60] ss:$8 sps:$4 sm:$0xff]  }
  0xd8   :  { %1795 = vmatpush1.bf16.msra.mxu0 %v3135_v44  ;;  %1878 = vmatprep.subr.bf16.mxu1 %v3146_v47  ;;  %v3214_v44 = vld [vmem:[#allocation5 + $0x4ec] ss:$16 sps:$4 sm:$0xff]   ;;  %v3212_v47 = vld [vmem:[#allocation5 + $0x4e8] ss:$16 sps:$4 sm:$0xff]  }
  0xd9   :  { %1796 = vmatprep.subr.bf16.mxu0 %v3143_v46  ;;  %v3310_v46 = vld [vmem:[#allocation7 + $0x74] ss:$8 sps:$4 sm:$0xff]  }
  0xdb   :  { %1879 = vmatpush1.bf16.msra.mxu1 %v3144_v49  ;;  %v3308_v49 = vld [vmem:[#allocation7 + $0x70] ss:$8 sps:$4 sm:$0xff]  }
  0xdc   :  { %1797 = vmatpush1.bf16.msra.mxu0 %v3141_v48  ;;  %1880 = vmatprep.subr.bf16.mxu1 %v3152_v51  ;;  %v3217_v48 = vld [vmem:[#allocation5 + $0x50c] ss:$16 sps:$4 sm:$0xff]   ;;  %v3215_v51 = vld [vmem:[#allocation5 + $0x508] ss:$16 sps:$4 sm:$0xff]  }
  0xdd   :  { %1798 = vmatprep.subr.bf16.mxu0 %v3149_v50  ;;  %v3313_v50 = vld [vmem:[#allocation7 + $0x84] ss:$8 sps:$4 sm:$0xff]  }
  0xdf   :  { %1881 = vmatpush1.bf16.msra.mxu1 %v3150_v54  ;;  %v3311_v54 = vld [vmem:[#allocation7 + $0x80] ss:$8 sps:$4 sm:$0xff]  }
  0xe0   :  { %1799 = vmatpush1.bf16.msra.mxu0 %v3147_v53  ;;  %1882 = vmatprep.subr.bf16.mxu1 %v3158_v56  ;;  %v3220_v53 = vld [vmem:[#allocation5 + $0x52c] ss:$16 sps:$4 sm:$0xff]   ;;  %v3218_v56 = vld [vmem:[#allocation5 + $0x528] ss:$16 sps:$4 sm:$0xff]  }
  0xe1   :  { %1800 = vmatprep.subr.bf16.mxu0 %v3155_v55  ;;  %v3316_v55 = vld [vmem:[#allocation7 + $0x94] ss:$8 sps:$4 sm:$0xff]  }
  0xe3   :  { %1883 = vmatpush1.bf16.msra.mxu1 %v3156_v58  ;;  %v3314_v58 = vld [vmem:[#allocation7 + $0x90] ss:$8 sps:$4 sm:$0xff]  }
  0xe4   :  { %1801 = vmatpush1.bf16.msra.mxu0 %v3153_v57  ;;  %1884 = vmatprep.subr.bf16.mxu1 %v3164_v60  ;;  %v3223_v57 = vld [vmem:[#allocation5 + $0x54c] ss:$16 sps:$4 sm:$0xff]   ;;  %v3221_v60 = vld [vmem:[#allocation5 + $0x548] ss:$16 sps:$4 sm:$0xff]  }
  0xe5   :  { %1802 = vmatprep.subr.bf16.mxu0 %v3161_v59  ;;  %v3319_v59 = vld [vmem:[#allocation7 + $0xa4] ss:$8 sps:$4 sm:$0xff]  }
  0xe7   :  { %1885 = vmatpush1.bf16.msra.mxu1 %v3162_v62  ;;  %v3317_v62 = vld [vmem:[#allocation7 + $0xa0] ss:$8 sps:$4 sm:$0xff]  }
  0xe8   :  { %1803 = vmatpush1.bf16.msra.mxu0 %v3159_v61  ;;  %1886 = vmatprep.subr.bf16.mxu1 %v3170_v0  ;;  %v3226_v61 = vld [vmem:[#allocation5 + $0x56c] ss:$16 sps:$4 sm:$0xff]   ;;  %v3224_v0 = vld [vmem:[#allocation5 + $0x568] ss:$16 sps:$4 sm:$0xff]  }
  0xe9   :  { %1804 = vmatprep.subr.bf16.mxu0 %v3167_v63  ;;  %v3322_v63 = vld [vmem:[#allocation7 + $0xb4] ss:$8 sps:$4 sm:$0xff]  }
  0xeb   :  { %1887 = vmatpush1.bf16.msra.mxu1 %v3168_v2  ;;  %v3320_v2 = vld [vmem:[#allocation7 + $0xb0] ss:$8 sps:$4 sm:$0xff]  }
  0xec   :  { %1805 = vmatpush1.bf16.msra.mxu0 %v3165_v1  ;;  %1888 = vmatprep.subr.bf16.mxu1 %v3176_v4  ;;  %v3229_v1 = vld [vmem:[#allocation5 + $0x58c] ss:$16 sps:$4 sm:$0xff]   ;;  %v3227_v4 = vld [vmem:[#allocation5 + $0x588] ss:$16 sps:$4 sm:$0xff]  }
  0xed   :  { %1806 = vmatprep.subr.bf16.mxu0 %v3173_v3  ;;  %v3325_v3 = vld [vmem:[#allocation7 + $0xc4] ss:$8 sps:$4 sm:$0xff]  }
  0xef   :  { %1889 = vmatpush1.bf16.msra.mxu1 %v3174_v6  ;;  %v3323_v6 = vld [vmem:[#allocation7 + $0xc0] ss:$8 sps:$4 sm:$0xff]  }
  0xf0   :  { %1807 = vmatpush1.bf16.msra.mxu0 %v3171_v5  ;;  %1890 = vmatprep.subr.bf16.mxu1 %v3182_v10  ;;  %v3232_v5 = vld [vmem:[#allocation5 + $0x5ac] ss:$16 sps:$4 sm:$0xff]   ;;  %v3230_v10 = vld [vmem:[#allocation5 + $0x5a8] ss:$16 sps:$4 sm:$0xff]  }
  0xf1   :  { %1808 = vmatprep.subr.bf16.mxu0 %v3179_v9  ;;  %v3328_v9 = vld [vmem:[#allocation7 + $0xd4] ss:$8 sps:$4 sm:$0xff]  }
  0xf3   :  { %1891 = vmatpush1.bf16.msra.mxu1 %v3180_v12  ;;  %v3326_v12 = vld [vmem:[#allocation7 + $0xd0] ss:$8 sps:$4 sm:$0xff]  }
  0xf4   :  { %1809 = vmatpush1.bf16.msra.mxu0 %v3177_v11  ;;  %1892 = vmatprep.subr.bf16.mxu1 %v3188_v15  ;;  %v3235_v11 = vld [vmem:[#allocation5 + $0x5cc] ss:$16 sps:$4 sm:$0xff]  }
  0xf5   :  { %1810 = vmatprep.subr.bf16.mxu0 %v3185_v13  ;;  %v3233_v13 = vld [vmem:[#allocation5 + $0x5c8] ss:$16 sps:$4 sm:$0xff]   ;;  %v3238_v15 = vld [vmem:[#allocation5 + $0x5ec] ss:$16 sps:$4 sm:$0xff]  }
  0xf7   :  { %1893 = vmatpush1.bf16.msra.mxu1 %v3186_v17  ;;  %v3241_v17 = vld [vmem:[#allocation5 + $0x60c] ss:$16 sps:$4 sm:$0xff]  }
  0xf8   :  { %1811 = vmatpush1.bf16.msra.mxu0 %v3183_v16  ;;  %1903 = vmatprep.subr.bf16.mxu1 %v3193_v18  ;;  %v3236_v16 = vld [vmem:[#allocation5 + $0x5e8] ss:$16 sps:$4 sm:$0xff]  }
  0xf9   :  { %2397 = vmatprep.subr.bf16.mxu0 %v3289_v25  ;;  %v3239_v18 = vld [vmem:[#allocation5 + $0x608] ss:$16 sps:$4 sm:$0xff]  }
  0xfa   :  { %1895 = vmatmul.mubr.bf16.vlgmr.msra.gmra.mrb[4].mxu1 %v3547_v8  ;;  %v3293_v8 = vld [vmem:[#allocation7 + $0x20] ss:$8 sps:$4 sm:$0xff]  }
  0xfb   :  { %1813 = vmatmul.mubr.bf16.vlgmr.msra.gmra.mrb[0].mxu0 %v3575_v22  ;;  %1904 = vmatpush1.bf16.msra.mxu1 %v3191_v21  ;;  %v3244_v21 = vld [vmem:[#allocation5 + $0x62c] ss:$16 sps:$4 sm:$0xff]   ;;  %v3245_v25 = vld [vmem:[#allocation5 + $0x648] ss:$16 sps:$4 sm:$0xff]  }
  0xfc   :  { %1935 = vmatprep.mubr.bf16.mxu1 %v3556_v35  ;;  %1905 = vmatprep.subr.bf16.mxu1 %v3196_v23  ;;  %v3205_v35 = vld [vmem:[#allocation5 + $0x48c] ss:$16 sps:$4 sm:$0xff]   ;;  %v3242_v23 = vld [vmem:[#allocation5 + $0x628] ss:$16 sps:$4 sm:$0xff]  }
  0xfd   :  { %2398 = vmatpush1.bf16.msra.mxu0 %v3287_v24  ;;  %v3247_v24 = vld [vmem:[#allocation5 + $0x64c] ss:$16 sps:$4 sm:$0xff]  }
  0xfe   :  { %2399 = vmatprep.subr.bf16.mxu0 %v3292_v27  ;;  %v3248_v27 = vld [vmem:[#allocation5 + $0x668] ss:$16 sps:$4 sm:$0xff]  }
  0xff   :  { %1906 = vmatpush1.bf16.msra.mxu1 %v3194_v26  ;;  %v3250_v26 = vld [vmem:[#allocation5 + $0x66c] ss:$16 sps:$4 sm:$0xff]  }
 0x100   :  { %1907 = vmatprep.subr.bf16.mxu1 %v3199_v7  ;;  %v3253_v7 = vld [vmem:[#allocation5 + $0x68c] ss:$16 sps:$4 sm:$0xff]  }
 0x101   :  { %2400 = vmatpush1.bf16.msra.mxu0 %v3290_v19  ;;  %v3251_v19 = vld [vmem:[#allocation5 + $0x688] ss:$16 sps:$4 sm:$0xff]  }
 0x102   :  { %2401 = vmatprep.subr.bf16.mxu0 %v3295_v28  ;;  %v3256_v28 = vld [vmem:[#allocation5 + $0x6ac] ss:$16 sps:$4 sm:$0xff]  }
 0x103   :  { %1908 = vmatpush1.bf16.msra.mxu1 %v3197_v29  ;;  %v3259_v29 = vld [vmem:[#allocation5 + $0x6cc] ss:$16 sps:$4 sm:$0xff]  }
 0x104   :  { %1909 = vmatprep.subr.bf16.mxu1 %v3202_v30 }
 0x105   :  { %2402 = vmatpush1.bf16.msra.mxu0 %v3293_v8 }
 0x106   :  { %2403 = vmatprep.subr.bf16.mxu0 %v3298_v31  ;;  %v3329_v31 = vld [vmem:[#allocation7 + $0xe0] ss:$8 sps:$4 sm:$0xff]  }
 0x107   :  { %1910 = vmatpush1.bf16.msra.mxu1 %v3200_v32 }
 0x108   :  { %1911 = vmatprep.subr.bf16.mxu1 %v3205_v35  ;;  %v3257_v35 = vld [vmem:[#allocation5 + $0x6c8] ss:$16 sps:$4 sm:$0xff]  }
 0x109   :  { %2404 = vmatpush1.bf16.msra.mxu0 %v3296_v33 }
 0x10a   :  { %2405 = vmatprep.subr.bf16.mxu0 %v3301_v52  ;;  %v3262_v52 = vld [vmem:[#allocation5 + $0x6ec] ss:$16 sps:$4 sm:$0xff]  }
 0x10b   :  { %1912 = vmatpush1.bf16.msra.mxu1 %v3203_v34  ;;  %v3334_v34 = vld [vmem:[#allocation7 + $0xf4] ss:$8 sps:$4 sm:$0xff]  }
 0x10c   :  { %1913 = vmatprep.subr.bf16.mxu1 %v3208_v36  ;;  %v3332_v36 = vld [vmem:[#allocation7 + $0xf0] ss:$8 sps:$4 sm:$0xff]  }
 0x10d   :  { %2406 = vmatpush1.bf16.msra.mxu0 %v3299_v37  ;;  %v3260_v37 = vld [vmem:[#allocation5 + $0x6e8] ss:$16 sps:$4 sm:$0xff]  }
 0x10e   :  { %2407 = vmatprep.subr.bf16.mxu0 %v3304_v38  ;;  %v3265_v38 = vld [vmem:[#allocation5 + $0x70c] ss:$16 sps:$4 sm:$0xff]  }
 0x10f   :  { %1914 = vmatpush1.bf16.msra.mxu1 %v3206_v39  ;;  %v3263_v39 = vld [vmem:[#allocation5 + $0x708] ss:$16 sps:$4 sm:$0xff]  }
 0x110   :  { %1915 = vmatprep.subr.bf16.mxu1 %v3211_v40  ;;  %v3337_v40 = vld [vmem:[#allocation7 + $0x104] ss:$8 sps:$4 sm:$0xff]  }
 0x111   :  { %2408 = vmatpush1.bf16.msra.mxu0 %v3302_v41  ;;  %v3268_v41 = vld [vmem:[#allocation5 + $0x72c] ss:$16 sps:$4 sm:$0xff]  }
 0x112   :  { %2409 = vmatprep.subr.bf16.mxu0 %v3307_v42  ;;  %v3266_v42 = vld [vmem:[#allocation5 + $0x728] ss:$16 sps:$4 sm:$0xff]  }
 0x113   :  { %1916 = vmatpush1.bf16.msra.mxu1 %v3209_v43  ;;  %v3271_v43 = vld [vmem:[#allocation5 + $0x74c] ss:$16 sps:$4 sm:$0xff]  }
 0x114   :  { %1917 = vmatprep.subr.bf16.mxu1 %v3214_v44  ;;  %v3269_v44 = vld [vmem:[#allocation5 + $0x748] ss:$16 sps:$4 sm:$0xff]  }
 0x115   :  { %2410 = vmatpush1.bf16.msra.mxu0 %v3305_v45  ;;  %v3274_v45 = vld [vmem:[#allocation5 + $0x76c] ss:$16 sps:$4 sm:$0xff]  }
 0x116   :  { %2411 = vmatprep.subr.bf16.mxu0 %v3310_v46  ;;  %v3272_v46 = vld [vmem:[#allocation5 + $0x768] ss:$16 sps:$4 sm:$0xff]  }
 0x117   :  { %1918 = vmatpush1.bf16.msra.mxu1 %v3212_v47  ;;  %v3277_v47 = vld [vmem:[#allocation5 + $0x78c] ss:$16 sps:$4 sm:$0xff]  }
 0x118   :  { %1919 = vmatprep.subr.bf16.mxu1 %v3217_v48  ;;  %v3275_v48 = vld [vmem:[#allocation5 + $0x788] ss:$16 sps:$4 sm:$0xff]  }
 0x119   :  { %2412 = vmatpush1.bf16.msra.mxu0 %v3308_v49  ;;  %v3280_v49 = vld [vmem:[#allocation5 + $0x7ac] ss:$16 sps:$4 sm:$0xff]  }
 0x11a   :  { %2413 = vmatprep.subr.bf16.mxu0 %v3313_v50  ;;  %v3278_v50 = vld [vmem:[#allocation5 + $0x7a8] ss:$16 sps:$4 sm:$0xff]  }
 0x11b   :  { %1920 = vmatpush1.bf16.msra.mxu1 %v3215_v51  ;;  %v3283_v51 = vld [vmem:[#allocation5 + $0x7cc] ss:$16 sps:$4 sm:$0xff]  }
 0x11c   :  { %1921 = vmatprep.subr.bf16.mxu1 %v3220_v53  ;;  %v3281_v53 = vld [vmem:[#allocation5 + $0x7c8] ss:$16 sps:$4 sm:$0xff]  }
 0x11d   :  { %2414 = vmatpush1.bf16.msra.mxu0 %v3311_v54  ;;  %v3286_v54 = vld [vmem:[#allocation5 + $0x7ec] ss:$16 sps:$4 sm:$0xff]  }
 0x11e   :  { %2415 = vmatprep.subr.bf16.mxu0 %v3316_v55  ;;  %v3284_v55 = vld [vmem:[#allocation5 + $0x7e8] ss:$16 sps:$4 sm:$0xff]  }
 0x11f   :  { %1922 = vmatpush1.bf16.msra.mxu1 %v3218_v56  ;;  %v329_v56 = vlaneseq }
 0x120   :  { %1923 = vmatprep.subr.bf16.mxu1 %v3223_v57 }
 0x121   :  { %2416 = vmatpush1.bf16.msra.mxu0 %v3314_v58  ;;  %v3583_v57 = vshrl.u32 %v329_v56, 7 }
 0x122   :  { %2417 = vmatprep.subr.bf16.mxu0 %v3319_v59  ;;  %v3591_v59 = vld [vmem:[%s3620_s2] sm:$0xf] }
 0x123   :  { %1924 = vmatpush1.bf16.msra.mxu1 %v3221_v60  ;;  %v3586_v58 = vsub.s32 0, %v3583_v57  ;;  %v335_v60 = vsub.s32 1, %v3583_v57 }
 0x124   :  { %1925 = vmatprep.subr.bf16.mxu1 %v3226_v61 }
 0x125   :  { %2418 = vmatpush1.bf16.msra.mxu0 %v3317_v62  ;;  %v332_v61 = vrot.slane %v3591_v59, %v3586_v58 }
 0x126   :  { %2419 = vmatprep.subr.bf16.mxu0 %v3322_v63 }
 0x127   :  { %1926 = vmatpush1.bf16.msra.mxu1 %v3224_v0 }
 0x128   :  { %1927 = vmatprep.subr.bf16.mxu1 %v3229_v1 }
 0x129   :  { %2420 = vmatpush1.bf16.msra.mxu0 %v3320_v2 }
 0x12a   :  { %2421 = vmatprep.subr.bf16.mxu0 %v3325_v3 }
 0x12b   :  { %1928 = vmatpush1.bf16.msra.mxu1 %v3227_v4 }
 0x12c   :  { %1929 = vmatprep.subr.bf16.mxu1 %v3232_v5 }
 0x12d   :  { %2422 = vmatpush1.bf16.msra.mxu0 %v3323_v6 }
 0x12e   :  { %2423 = vmatprep.subr.bf16.mxu0 %v3328_v9 }
 0x12f   :  { %1930 = vmatpush1.bf16.msra.mxu1 %v3230_v10 }
 0x130   :  { %1931 = vmatprep.subr.bf16.mxu1 %v3235_v11 }
 0x131   :  { %2424 = vmatpush1.bf16.msra.mxu0 %v3326_v12 }
 0x133   :  { %1932 = vmatpush1.bf16.msra.mxu1 %v3233_v13  ;;  %v3335_v13 = vld [vmem:[#allocation7 + $0x100] ss:$8 sps:$4 sm:$0xff]  }
 0x134   :  { %1933 = vmatprep.subr.bf16.mxu1 %v3238_v15 }
 0x137   :  { %1934 = vmatpush1.bf16.msra.mxu1 %v3236_v16  ;;  %v3340_v16 = vld [vmem:[#allocation7 + $0x114] ss:$8 sps:$4 sm:$0xff]  }
 0x138   :  { %1944 = vmatprep.subr.bf16.mxu1 %v3241_v17  ;;  %v3338_v17 = vld [vmem:[#allocation7 + $0x110] ss:$8 sps:$4 sm:$0xff]  }
 0x13a   :  { %1936 = vmatmul.mubr.bf16.vlgmr.msra.gmra.mrb[4].mxu1 %v3561_v14  ;;  %v3254_v14 = vld [vmem:[#allocation5 + $0x6a8] ss:$16 sps:$4 sm:$0xff]  }
 0x13b   :  { %1945 = vmatpush1.bf16.msra.mxu1 %v3239_v18  ;;  %1976 = vmatprep.mubr.bf16.mxu1 %v3567_v20  ;;  %v3331_v20 = vld [vmem:[#allocation7 + $0xe4] ss:$8 sps:$4 sm:$0xff]  }
 0x13c   :  { %1946 = vmatprep.subr.bf16.mxu1 %v3244_v21  ;;  %2425 = vmatprep.subr.bf16.mxu0 %v3331_v20  ;;  %v3343_v18 = vld [vmem:[#allocation7 + $0x124] ss:$8 sps:$4 sm:$0xff]   ;;  %v3341_v21 = vld [vmem:[#allocation7 + $0x120] ss:$8 sps:$4 sm:$0xff]  }
 0x13d   :  { %2426 = vmatpush1.bf16.msra.mxu0 %v3329_v31  ;;  %v3359_v20 = vld [vmem:[#allocation7 + $0x180] ss:$8 sps:$4 sm:$0xff]   ;;  %v3362_v31 = vld [vmem:[#allocation7 + $0x190] ss:$8 sps:$4 sm:$0xff]  }
 0x13e   :  { %2427 = vmatprep.subr.bf16.mxu0 %v3334_v34  ;;  %v3373_v34 = vld [vmem:[#allocation7 + $0x1c4] ss:$8 sps:$4 sm:$0xff]  }
 0x13f   :  { %1947 = vmatpush1.bf16.msra.mxu1 %v3242_v23  ;;  %v3346_v23 = vld [vmem:[#allocation7 + $0x134] ss:$8 sps:$4 sm:$0xff]  }
 0x140   :  { %1948 = vmatprep.subr.bf16.mxu1 %v3247_v24  ;;  %v3344_v24 = vld [vmem:[#allocation7 + $0x130] ss:$8 sps:$4 sm:$0xff]  }
 0x141   :  { %2428 = vmatpush1.bf16.msra.mxu0 %v3332_v36  ;;  %v3371_v36 = vld [vmem:[#allocation7 + $0x1c0] ss:$8 sps:$4 sm:$0xff]  }
 0x142   :  { %2438 = vmatprep.subr.bf16.mxu0 %v3337_v40  ;;  %v3377_v40 = vld [vmem:[#allocation7 + $0x1e0] ss:$8 sps:$4 sm:$0xff]  }
 0x143   :  { %1949 = vmatpush1.bf16.msra.mxu1 %v3245_v25  ;;  %v3349_v25 = vld [vmem:[#allocation7 + $0x144] ss:$8 sps:$4 sm:$0xff]  }
 0x144   :  { %1950 = vmatprep.subr.bf16.mxu1 %v3250_v26  ;;  %v3347_v26 = vld [vmem:[#allocation7 + $0x140] ss:$8 sps:$4 sm:$0xff]  }
 0x147   :  { %1951 = vmatpush1.bf16.msra.mxu1 %v3248_v27  ;;  %v3352_v27 = vld [vmem:[#allocation7 + $0x154] ss:$8 sps:$4 sm:$0xff]  }
 0x148   :  { %1952 = vmatprep.subr.bf16.mxu1 %v3253_v7  ;;  %v3350_v7 = vld [vmem:[#allocation7 + $0x150] ss:$8 sps:$4 sm:$0xff]  }
 0x14b   :  { %1953 = vmatpush1.bf16.msra.mxu1 %v3251_v19  ;;  %v3355_v19 = vld [vmem:[#allocation7 + $0x164] ss:$8 sps:$4 sm:$0xff]  }
 0x14c   :  { %1954 = vmatprep.subr.bf16.mxu1 %v3256_v28  ;;  %v3353_v28 = vld [vmem:[#allocation7 + $0x160] ss:$8 sps:$4 sm:$0xff]  }
 0x14d   :  { %v1691_v30 = vpop.f32.mrb[0].mxu1 }
 0x14e   :  { %v1693_v8 = vpop.f32.mrb[1].mxu1  ;;  %v1692_v62 = vadd.f32 %v1691_v30, %v332_v61  ;;  %v3361_v30 = vld [vmem:[#allocation7 + $0x184] ss:$8 sps:$4 sm:$0xff]  }
 0x14f   :  { %v1695_v32 = vpop.f32.mrb[2].mxu1  ;;  %1955 = vmatpush1.bf16.msra.mxu1 %v3254_v14  ;;  %v3358_v14 = vld [vmem:[#allocation7 + $0x174] ss:$8 sps:$4 sm:$0xff]  }
 0x150   :  { %v1696_v33 = vpop.f32.mrb[3].mxu1  ;;  %1956 = vmatprep.subr.bf16.mxu1 %v3259_v29  ;;  %v3356_v29 = vld [vmem:[#allocation7 + $0x170] ss:$8 sps:$4 sm:$0xff]   ;;  %v3367_v32 = vld [vmem:[#allocation7 + $0x1a4] ss:$8 sps:$4 sm:$0xff]  }
 0x151   :  { %v3370_v33 = vld [vmem:[#allocation7 + $0x1b4] ss:$8 sps:$4 sm:$0xff]  }
 0x153   :  { %1957 = vmatpush1.bf16.msra.mxu1 %v3257_v35  ;;  %v3365_v35 = vld [vmem:[#allocation7 + $0x1a0] ss:$8 sps:$4 sm:$0xff]  }
 0x154   :  { %1958 = vmatprep.subr.bf16.mxu1 %v3262_v52  ;;  %v3368_v52 = vld [vmem:[#allocation7 + $0x1b0] ss:$8 sps:$4 sm:$0xff]  }
 0x157   :  { %1959 = vmatpush1.bf16.msra.mxu1 %v3260_v37  ;;  %v3376_v37 = vld [vmem:[#allocation7 + $0x1d4] ss:$8 sps:$4 sm:$0xff]  }
 0x158   :  { %1960 = vmatprep.subr.bf16.mxu1 %v3265_v38  ;;  %v3374_v38 = vld [vmem:[#allocation7 + $0x1d0] ss:$8 sps:$4 sm:$0xff]  }
 0x15b   :  { %1961 = vmatpush1.bf16.msra.mxu1 %v3263_v39  ;;  %v3379_v39 = vld [vmem:[#allocation7 + $0x1e4] ss:$8 sps:$4 sm:$0xff]  }
 0x15c   :  { %1962 = vmatprep.subr.bf16.mxu1 %v3268_v41  ;;  %v3382_v41 = vld [vmem:[#allocation7 + $0x1f4] ss:$8 sps:$4 sm:$0xff]  }
 0x15f   :  { %1963 = vmatpush1.bf16.msra.mxu1 %v3266_v42  ;;  %v3380_v42 = vld [vmem:[#allocation7 + $0x1f0] ss:$8 sps:$4 sm:$0xff]  }
 0x160   :  { %1964 = vmatprep.subr.bf16.mxu1 %v3271_v43  ;;  %v339_v43 = vsub.s32 2, %v3583_v57 }
 0x163   :  { %1965 = vmatpush1.bf16.msra.mxu1 %v3269_v44  ;;  %v343_v44 = vsub.s32 3, %v3583_v57 }
 0x164   :  { %1966 = vmatprep.subr.bf16.mxu1 %v3274_v45  ;;  %v340_v45 = vrot.slane %v3591_v59, %v339_v43 }
 0x167   :  { %1967 = vmatpush1.bf16.msra.mxu1 %v3272_v46  ;;  %v344_v46 = vrot.slane %v3591_v59, %v343_v44 }
 0x168   :  { %1968 = vmatprep.subr.bf16.mxu1 %v3277_v47 }
 0x16b   :  { %1969 = vmatpush1.bf16.msra.mxu1 %v3275_v48 }
 0x16c   :  { %1970 = vmatprep.subr.bf16.mxu1 %v3280_v49 }
 0x16f   :  { %1971 = vmatpush1.bf16.msra.mxu1 %v3278_v50 }
 0x170   :  { %1972 = vmatprep.subr.bf16.mxu1 %v3283_v51 }
 0x173   :  { %1973 = vmatpush1.bf16.msra.mxu1 %v3281_v53 }
 0x174   :  { %1974 = vmatprep.subr.bf16.mxu1 %v3286_v54 }
 0x177   :  { %1975 = vmatpush1.bf16.msra.mxu1 %v3284_v55 }
 0x17a   :  { %1977 = vmatmul.mubr.bf16.vlgmr.msra.gmra.mrb[4].mxu1 %v3575_v22  ;;  %v336_v22 = vrot.slane %v3591_v59, %v335_v60  ;;  %v2485_v59 = vld [vmem:[%s3623_s5] sm:$0x3] }
 0x17c   :  { %v1694_v63 = vadd.f32 %v1693_v8, %v336_v22  ;;  %v3364_v8 = vld [vmem:[#allocation7 + $0x194] ss:$8 sps:$4 sm:$0xff]  }
 0x1ce   :  { %v1814_v0 = vpop.f32.mrb[0].mxu0 }
 0x1cf   :  { %v2857_v1 = vadd.f32 %v1814_v0, %v1692_v62  ;;  %v1816_v2 = vpop.f32.mrb[1].mxu0  ;;  %v2486_v0 = vunpack.c.l.bf16 %v2485_v59 }
 0x1d0   :  { %v2859_v3 = vadd.f32 %v1816_v2, %v1694_v63  ;;  %v1818_v4 = vpop.f32.mrb[2].mxu0  ;;  %v2065_v63 = vld [vmem:[%s3622_s4] sm:$0x3] }
 0x1d1   :  { %vm1985_vm0 = vcmp.gt.f32.partialorder %v2857_v1, 0.0  ;;  %v1989_v5 = vmul.f32 0.2, %v2857_v1  ;;  %v1819_v6 = vpop.f32.mrb[3].mxu0  ;;  %v2074_v2 = vrot.slane %v2065_v63, %v335_v60  ;;  %v2495_v4 = vrot.slane %v2486_v0, %v339_v43 }
 0x1d2   :  { %vm1986_vm1 = vcmp.gt.f32.partialorder %v2859_v3, 0.0  ;;  %v1990_v9 = vmul.f32 0.2, %v2859_v3 }
 0x1d3   :  { %v1993_v10 = vsel %vm1985_vm0, %v2857_v1, %v1989_v5  ;;  %v2070_v1 = vrot.slane %v2065_v63, %v3586_v58 }
 0x1d4   :  { %v1994_v11 = vsel %vm1986_vm1, %v2859_v3, %v1990_v9  ;;  %v1997_v15 = vpack.c.bf16 %v1993_v10, %v1993_v10  ;;  %v2491_v3 = vrot.slane %v2486_v0, %v3586_v58 }
 0x1d5   :  { %v1998_v12 = vpack.c.bf16 %v1994_v11, %v1994_v11 }
 0x1d7   :  { %2429 = vmatprep.mubr.bf16.mxu0 %v1998_v12  ;;  %v2501_v12 = vrot.slane %v2491_v3, %v3586_v58 }
 0x1d8   :  { %2430 = vmatmul.mubr.bf16.vlgmr.msra.gmra.mrb[4].mxu0 %v1997_v15 }
 0x1d9   :  { %2439 = vmatpush1.bf16.msra.mxu0 %v3335_v13 }
 0x1da   :  { %2440 = vmatprep.subr.bf16.mxu0 %v3340_v16  ;;  %v2505_v16 = vrot.slane %v2495_v4, %v3586_v58 }
 0x1dd   :  { %2441 = vmatpush1.bf16.msra.mxu0 %v3338_v17 }
 0x1de   :  { %2442 = vmatprep.subr.bf16.mxu0 %v3343_v18 }
 0x1e1   :  { %2443 = vmatpush1.bf16.msra.mxu0 %v3341_v21 }
 0x1e2   :  { %2444 = vmatprep.subr.bf16.mxu0 %v3346_v23 }
 0x1e5   :  { %2445 = vmatpush1.bf16.msra.mxu0 %v3344_v24  ;;  %v2855_v24 = vld [vmem:[#allocation2] ss:$0 sm:$0xff] }
 0x1e6   :  { %2446 = vmatprep.subr.bf16.mxu0 %v3349_v25 }
 0x1e9   :  { %2447 = vmatpush1.bf16.msra.mxu0 %v3347_v26 }
 0x1ea   :  { %2448 = vmatprep.subr.bf16.mxu0 %v3352_v27 }
 0x1ed   :  { %2449 = vmatpush1.bf16.msra.mxu0 %v3350_v7 }
 0x1ee   :  { %2450 = vmatprep.subr.bf16.mxu0 %v3355_v19 }
 0x1f1   :  { %2451 = vmatpush1.bf16.msra.mxu0 %v3353_v28 }
 0x1f2   :  { %2452 = vmatprep.subr.bf16.mxu0 %v3358_v14 }
 0x1f5   :  { %2453 = vmatpush1.bf16.msra.mxu0 %v3356_v29 }
 0x1f6   :  { %2454 = vmatprep.subr.bf16.mxu0 %v3361_v30 }
 0x1f9   :  { %2455 = vmatpush1.bf16.msra.mxu0 %v3359_v20 }
 0x1fa   :  { %2456 = vmatprep.subr.bf16.mxu0 %v3364_v8 }
 0x1fd   :  { %2457 = vmatpush1.bf16.msra.mxu0 %v3362_v31 }
 0x1fe   :  { %2458 = vmatprep.subr.bf16.mxu0 %v3367_v32 }
 0x201   :  { %2459 = vmatpush1.bf16.msra.mxu0 %v3365_v35 }
 0x202   :  { %2460 = vmatprep.subr.bf16.mxu0 %v3370_v33 }
 0x205   :  { %2461 = vmatpush1.bf16.msra.mxu0 %v3368_v52 }
 0x206   :  { %2462 = vmatprep.subr.bf16.mxu0 %v3373_v34 }
 0x209   :  { %2463 = vmatpush1.bf16.msra.mxu0 %v3371_v36 }
 0x20a   :  { %2464 = vmatprep.subr.bf16.mxu0 %v3376_v37 }
 0x20d   :  { %2465 = vmatpush1.bf16.msra.mxu0 %v3374_v38 }
 0x20e   :  { %2466 = vmatprep.subr.bf16.mxu0 %v3379_v39 }
 0x211   :  { %2467 = vmatpush1.bf16.msra.mxu0 %v3377_v40 }
 0x212   :  { %2468 = vmatprep.subr.bf16.mxu0 %v3382_v41 }
 0x215   :  { %2469 = vmatpush1.bf16.msra.mxu0 %v3380_v42 }
 0x24d   :  { %v1978_v47 = vpop.f32.mrb[4].mxu1 }
 0x24e   :  { %v2860_v48 = vadd.f32 %v1978_v47, %v340_v45  ;;  %v1980_v49 = vpop.f32.mrb[5].mxu1 }
 0x24f   :  { %v2861_v50 = vadd.f32 %v1980_v49, %v344_v46  ;;  %v1982_v51 = vpop.f32.mrb[6].mxu1 }
 0x250   :  { %vm1987_vm2 = vcmp.gt.f32.partialorder %v2860_v48, 0.0  ;;  %v1991_v53 = vmul.f32 0.2, %v2860_v48  ;;  %v1983_v54 = vpop.f32.mrb[7].mxu1 }
 0x251   :  { %vm1988_vm3 = vcmp.gt.f32.partialorder %v2861_v50, 0.0  ;;  %v1992_v55 = vmul.f32 0.2, %v2861_v50 }
 0x252   :  { %v1995_v56 = vsel %vm1987_vm2, %v2860_v48, %v1991_v53 }
 0x253   :  { %v1996_v61 = vsel %vm1988_vm3, %v2861_v50, %v1992_v55  ;;  %v1999_v62 = vpack.c.bf16 %v1995_v56, %v1995_v56 }
 0x254   :  { %v2000_v22 = vpack.c.bf16 %v1996_v61, %v1996_v61 }
 0x256   :  { %2470 = vmatprep.mubr.bf16.mxu0 %v2000_v22 }
 0x257   :  { %2471 = vmatmul.mubr.bf16.vlgmr.msra.gmra.mrb[4].mxu0 %v1999_v62 }
 0x32a   :  { %v2472_v5 = vpop.f32.mrb[4].mxu0 }
 0x32b   :  { %v2862_v6 = vadd.f32 %v2472_v5, %v2070_v1  ;;  %v2474_v9 = vpop.f32.mrb[5].mxu0 }
 0x32c   :  { %v2863_v10 = vadd.f32 %v2474_v9, %v2074_v2  ;;  %v2476_v11 = vpop.f32.mrb[6].mxu0 }
 0x32d   :  { %vm2479_vm4 = vcmp.gt.f32.partialorder %v2862_v6, 0.0  ;;  %v2481_v13 = vmul.f32 0.2, %v2862_v6  ;;  %v2477_v15 = vpop.f32.mrb[7].mxu0 }
 0x32e   :  { %vm2480_vm5 = vcmp.gt.f32.partialorder %v2863_v10, 0.0  ;;  %v2482_v17 = vmul.f32 0.2, %v2863_v10 }
 0x32f   :  { %v2483_v18 = vsel %vm2479_vm4, %v2862_v6, %v2481_v13 }
 0x330   :  { %v2484_v57 = vsel %vm2480_vm5, %v2863_v10, %v2482_v17  ;;  %v2506_v60 = vmul.f32 %v2501_v12, %v2483_v18 }
 0x331   :  { %v2507_v21 = vmul.f32 %v2505_v16, %v2484_v57 }
 0x333   :  { %v2508_v23 = vadd.f32 %v2507_v21, %v2506_v60 }
 0x335   :  { %2509 = vadd.xlane.f32.xlu0 %v2508_v23 }
 0x3c2   :  { %v2510_v25 = vpop.xlane.xlu0 %2509 }
 0x3c3   :  { %v2518_v26 = vadd.f32 %v2855_v24, %v2510_v25 }
 0x3c5   :  { %2520 = vst.msk [vmem:[%s3625_s7] sm:$0xff] %vm2519_vm6, %v2518_v26 }
 0x3c6   :  { %2525 = vsyncpa [#allocation4], 1 }
 0x3c7   :  { %2526 = vsyncpa [#allocation6], 1 }

</bundles_post_ra>
